<compile_context>
chip_gen: v6e
topology: v6e:2x2x1
jax: 0.10.0
libtpu: 0.0.40
codegen_flags: <defaults>
</compile_context>

<pallas_src>
import functools

import jax
import jax.numpy as jnp
from jax.experimental import pallas as pl
from jax.experimental.pallas import tpu as pltpu


def _param_lstm_kernel(ids_ref, embp_ref, whh_ref, wfc_ref, bfc_ref, out_ref, xg_ref,
                       *, batch, batch_pad, seq_len, hidden):
    """Fused gather/input-projection prologue + unrolled LSTM recurrence + FC head.

    ids_ref : (B, T) int32 in SMEM            token ids
    embp_ref: (V, 4H) f32  in VMEM            emb @ W_ih + (b_ih + b_hh), gate order (i,f,g,o)
    whh_ref : (H, 4H) bf16 in VMEM            fused hidden->hidden weights
    wfc_ref : (H, O)  f32  in VMEM            fc weight (pre-transposed)
    bfc_ref : (1, O)  f32  in VMEM            fc bias
    out_ref : (B_pad, O) f32                  log-probabilities from final hidden state
    xg_ref  : (T*B_pad, 4H) f32 VMEM scratch  time-major projected inputs, row = t*B_pad + b
    """
    B, Bp, T, H = batch, batch_pad, seq_len, hidden
    G = 4 * H  # 128 for H=32: one full lane set

    # ---- Prologue: fused embedding gather == input projection (+ bias).
    # Rows are written time-major so each timestep's gate block is one
    # sublane-aligned (8, 128) tile.  Pad rows (b >= B) reuse a real token; they
    # stay finite and are sliced away by the wrapper.
    for t in range(T):
        for b in range(Bp):
            r = t * Bp + b
            tok = ids_ref[min(b, B - 1), t]                      # SMEM scalar read
            xg_ref[r:r + 1, :] = embp_ref[pl.ds(tok, 1), :]      # dynamic row gather

    # ---- Serial recurrence, fully unrolled; only h @ W_hh is per-step MXU work.
    w_hh = whh_ref[...]                                          # (H, 4H) bf16, hoisted
    h = jnp.zeros((Bp, H), jnp.float32)
    c = jnp.zeros((Bp, H), jnp.float32)

    for t in range(T):
        xg_t = xg_ref[t * Bp:(t + 1) * Bp, :]                    # aligned (8, 128) load
        gates = xg_t + jnp.dot(h.astype(jnp.bfloat16), w_hh,
                               preferred_element_type=jnp.float32)   # (Bp, 4H) f32
        # Full-vreg activations: 2 EUP pushes (+1 tanh(c)) per step instead of 5.
        # sigmoid(x) == 0.5 * tanh(0.5 * x) + 0.5 (no exp + divide on the chain).
        sg = 0.5 * jnp.tanh(0.5 * gates) + 0.5                   # lanes: [ i | f | . | o ]
        tg = jnp.tanh(gates)                                     # lanes: [ . | . | g | . ]
        i_g = sg[:, 0 * H:1 * H]
        f_g = sg[:, 1 * H:2 * H]
        g_g = tg[:, 2 * H:3 * H]
        o_g = sg[:, 3 * H:4 * H]
        c = f_g * c + i_g * g_g                                  # f32 state
        h = o_g * jnp.tanh(c)

    # ---- FC head + numerically stable log_softmax (f32 throughout).
    logits = (jnp.dot(h, wfc_ref[...], preferred_element_type=jnp.float32)
              + bfc_ref[...])                                    # (Bp, O)
    m = jnp.max(logits, axis=1, keepdims=True)
    z = logits - m
    lse = jnp.log(jnp.sum(jnp.exp(z), axis=1, keepdims=True))
    out_ref[...] = (z - lse).astype(out_ref.dtype)


def prepare_params(params):
    """One-time weight preprocessing (exact): fold the embedding, W_ih and the
    combined bias into a per-vocab gate-preactivation table, and pre-cast W_hh
    to bf16 for the MXU."""
    emb_proj = params["embedding"].astype(jnp.float32) @ params["w_ih"] + params["b"]
    return {
        "emb_proj": emb_proj.astype(jnp.float32),            # (V, 4H)
        "w_hh_bf16": params["w_hh"].astype(jnp.bfloat16),     # (H, 4H)
        "w_fc": params["w_fc"].astype(jnp.float32),           # (H, O)
        "b_fc": params["b_fc"].astype(jnp.float32),           # (1, O)
    }


def param_lstm_forward(token_ids, kparams):
    """token_ids: (B, T) int.  Returns (B, output_dim) float32 log-probs."""
    emb_proj = kparams["emb_proj"]
    w_hh = kparams["w_hh_bf16"]
    w_fc = kparams["w_fc"]
    b_fc = kparams["b_fc"]

    B, T = token_ids.shape
    H = w_hh.shape[0]
    O = w_fc.shape[1]
    B_pad = max(8, ((B + 7) // 8) * 8)        # one f32 sublane tile per time step

    kernel = functools.partial(_param_lstm_kernel,
                               batch=B, batch_pad=B_pad, seq_len=T, hidden=H)

    # Advisory cost estimate (helps XLA schedule around the serial kernel).
    flops = 2 * T * B_pad * H * 4 * H + 2 * B_pad * H * O
    transcendentals = T * B_pad * (2 * 4 * H + H) + B_pad * (O + 1)
    bytes_accessed = (4 * (emb_proj.size + w_fc.size + b_fc.size + B_pad * O)
                      + 2 * w_hh.size + 4 * B * T)

    out = pl.pallas_call(
        kernel,
        out_shape=jax.ShapeDtypeStruct((B_pad, O), jnp.float32),
        in_specs=[
            pl.BlockSpec(memory_space=pltpu.MemorySpace.SMEM),   # token ids (scalars)
            pl.BlockSpec(memory_space=pltpu.MemorySpace.VMEM),   # emb_proj table
            pl.BlockSpec(memory_space=pltpu.MemorySpace.VMEM),   # w_hh (bf16)
            pl.BlockSpec(memory_space=pltpu.MemorySpace.VMEM),   # w_fc
            pl.BlockSpec(memory_space=pltpu.MemorySpace.VMEM),   # b_fc
        ],
        out_specs=pl.BlockSpec(memory_space=pltpu.MemorySpace.VMEM),
        scratch_shapes=[pltpu.VMEM((T * B_pad, 4 * H), jnp.float32)],
        cost_estimate=pl.CostEstimate(flops=flops,
                                      transcendentals=transcendentals,
                                      bytes_accessed=bytes_accessed),
    )(token_ids.astype(jnp.int32), emb_proj, w_hh, w_fc, b_fc)

    return out[:B]                              # drop padded batch rows


def init_params(key, vocab_size, embed_dim, hidden_dim, output_dim):
    ks = jax.random.split(key, 7)
    scale = 0.1
    emb = jax.random.normal(ks[0], (vocab_size, embed_dim), jnp.float32) * scale
    # PyTorch LSTM gate order (i, f, g, o), fused along the output dim and stored
    # pre-transposed so x @ W_ih and h @ W_hh are computed directly.
    w_ih = jax.random.normal(ks[1], (embed_dim, 4 * hidden_dim), jnp.float32) * scale
    w_hh = jax.random.normal(ks[2], (hidden_dim, 4 * hidden_dim), jnp.float32) * scale
    b_ih = jax.random.normal(ks[3], (1, 4 * hidden_dim), jnp.float32) * scale
    b_hh = jax.random.normal(ks[4], (1, 4 * hidden_dim), jnp.float32) * scale
    w_fc = jax.random.normal(ks[5], (hidden_dim, output_dim), jnp.float32) * scale
    b_fc = jax.random.normal(ks[6], (1, output_dim), jnp.float32) * scale
    return {
        "embedding": emb,
        "w_ih": w_ih,
        "w_hh": w_hh,
        "b": b_ih + b_hh,
        "w_fc": w_fc,
        "b_fc": b_fc,
    }


def _reference_forward(token_ids, params):
    """Pure-JAX f32 reference matching PyTorch semantics (num_layers=1,
    unidirectional; dropout is a no-op in this configuration)."""
    xe = params["embedding"][token_ids].astype(jnp.float32)    # (B, T, E)
    B, T, E = xe.shape
    H = params["w_hh"].shape[0]
    h = jnp.zeros((B, H), jnp.float32)
    c = jnp.zeros((B, H), jnp.float32)

    def step(carry, x_t):
        h, c = carry
        gates = x_t @ params["w_ih"] + h @ params["w_hh"] + params["b"]
        i = jax.nn.sigmoid(gates[:, 0 * H:1 * H])
        f = jax.nn.sigmoid(gates[:, 1 * H:2 * H])
        g = jnp.tanh(gates[:, 2 * H:3 * H])
        o = jax.nn.sigmoid(gates[:, 3 * H:4 * H])
        c = f * c + i * g
        h = o * jnp.tanh(c)
        return (h, c), None

    (h, _), _ = jax.lax.scan(step, (h, c), jnp.transpose(xe, (1, 0, 2)))
    logits = h @ params["w_fc"] + params["b_fc"]
    return jax.nn.log_softmax(logits, axis=1)


if __name__ == "__main__":
    # Small shapes consistent with the module's forward.
    VOCAB, EMBED, HIDDEN, OUT = 50, 32, 32, 4
    B, T = 2, 8

    key = jax.random.PRNGKey(0)
    k_params, k_ids = jax.random.split(key)
    params = init_params(k_params, VOCAB, EMBED, HIDDEN, OUT)
    kparams = prepare_params(params)               # one-time weight layout/fusion
    token_ids = jax.random.randint(k_ids, (B, T), 0, VOCAB, dtype=jnp.int32)

    fwd = jax.jit(param_lstm_forward)
    out = jax.block_until_ready(fwd(token_ids, kparams))

    ref = _reference_forward(token_ids, params)
    assert out.shape == (B, OUT)
    # bf16 operands in the recurrence matmul -> slightly relaxed tolerance
    # (observed error is O(1e-3); state/elementwise math stays f32).
    assert jnp.allclose(out, ref, rtol=2e-2, atol=2e-2), "mismatch vs reference"
    # log_softmax rows should sum (in prob space) to ~1
    assert jnp.allclose(jnp.sum(jnp.exp(out), axis=1), 1.0, atol=1e-3)

    print("KERNEL_OK")
</pallas_src>

<mosaic_0001>
module attributes {stable_mosaic.version = 11 : i64} {
  func.func @_param_lstm_kernel(%arg0: memref<2x8xi32, #tpu.memory_space<smem>>, %arg1: memref<50x128xf32, #tpu.memory_space<vmem>>, %arg2: memref<32x128xbf16, #tpu.memory_space<vmem>>, %arg3: memref<32x4xf32, #tpu.memory_space<vmem>>, %arg4: memref<1x4xf32, #tpu.memory_space<vmem>>, %arg5: memref<8x4xf32, #tpu.memory_space<vmem>>, %arg6: memref<64x128xf32, #tpu.memory_space<vmem>>) attributes {dimension_semantics = [], scalar_prefetch = 0 : i64, scratch_operands = 1 : i64, tpu.core_type = #tpu.core_type<tc>} {
    %c0 = arith.constant 0 : index
    %c0_0 = arith.constant 0 : index
    %0 = memref.load %arg0[%c0, %c0_0] : memref<2x8xi32, #tpu.memory_space<smem>>
    %1 = arith.index_cast %0 : i32 to index
    %c0_1 = arith.constant 0 : index
    %2 = vector.load %arg1[%1, %c0_1] : memref<50x128xf32, #tpu.memory_space<vmem>>, vector<1x128xf32>
    %c0_2 = arith.constant 0 : index
    %c0_3 = arith.constant 0 : index
    %3 = vector.load %arg6[%c0_2, %c0_3] : memref<64x128xf32, #tpu.memory_space<vmem>>, vector<1x128xf32>
    tpu.vector_store %arg6[%c0_2, %c0_3], %2 {strides = array<i32>} : memref<64x128xf32, #tpu.memory_space<vmem>>, vector<1x128xf32>,
    %c1 = arith.constant 1 : index
    %c0_4 = arith.constant 0 : index
    %4 = memref.load %arg0[%c1, %c0_4] : memref<2x8xi32, #tpu.memory_space<smem>>
    %5 = arith.index_cast %4 : i32 to index
    %c0_5 = arith.constant 0 : index
    %6 = vector.load %arg1[%5, %c0_5] : memref<50x128xf32, #tpu.memory_space<vmem>>, vector<1x128xf32>
    %c1_6 = arith.constant 1 : index
    %c0_7 = arith.constant 0 : index
    %7 = vector.load %arg6[%c1_6, %c0_7] : memref<64x128xf32, #tpu.memory_space<vmem>>, vector<1x128xf32>
    tpu.vector_store %arg6[%c1_6, %c0_7], %6 {strides = array<i32>} : memref<64x128xf32, #tpu.memory_space<vmem>>, vector<1x128xf32>,
    %c1_8 = arith.constant 1 : index
    %c0_9 = arith.constant 0 : index
    %8 = memref.load %arg0[%c1_8, %c0_9] : memref<2x8xi32, #tpu.memory_space<smem>>
    %9 = arith.index_cast %8 : i32 to index
    %c0_10 = arith.constant 0 : index
    %10 = vector.load %arg1[%9, %c0_10] : memref<50x128xf32, #tpu.memory_space<vmem>>, vector<1x128xf32>
    %c2 = arith.constant 2 : index
    %c0_11 = arith.constant 0 : index
    %11 = vector.load %arg6[%c2, %c0_11] : memref<64x128xf32, #tpu.memory_space<vmem>>, vector<1x128xf32>
    tpu.vector_store %arg6[%c2, %c0_11], %10 {strides = array<i32>} : memref<64x128xf32, #tpu.memory_space<vmem>>, vector<1x128xf32>,
    %c1_12 = arith.constant 1 : index
    %c0_13 = arith.constant 0 : index
    %12 = memref.load %arg0[%c1_12, %c0_13] : memref<2x8xi32, #tpu.memory_space<smem>>
    %13 = arith.index_cast %12 : i32 to index
    %c0_14 = arith.constant 0 : index
    %14 = vector.load %arg1[%13, %c0_14] : memref<50x128xf32, #tpu.memory_space<vmem>>, vector<1x128xf32>
    %c3 = arith.constant 3 : index
    %c0_15 = arith.constant 0 : index
    %15 = vector.load %arg6[%c3, %c0_15] : memref<64x128xf32, #tpu.memory_space<vmem>>, vector<1x128xf32>
    tpu.vector_store %arg6[%c3, %c0_15], %14 {strides = array<i32>} : memref<64x128xf32, #tpu.memory_space<vmem>>, vector<1x128xf32>,
    %c1_16 = arith.constant 1 : index
    %c0_17 = arith.constant 0 : index
    %16 = memref.load %arg0[%c1_16, %c0_17] : memref<2x8xi32, #tpu.memory_space<smem>>
    %17 = arith.index_cast %16 : i32 to index
    %c0_18 = arith.constant 0 : index
    %18 = vector.load %arg1[%17, %c0_18] : memref<50x128xf32, #tpu.memory_space<vmem>>, vector<1x128xf32>
    %c4 = arith.constant 4 : index
    %c0_19 = arith.constant 0 : index
    %19 = vector.load %arg6[%c4, %c0_19] : memref<64x128xf32, #tpu.memory_space<vmem>>, vector<1x128xf32>
    tpu.vector_store %arg6[%c4, %c0_19], %18 {strides = array<i32>} : memref<64x128xf32, #tpu.memory_space<vmem>>, vector<1x128xf32>,
    %c1_20 = arith.constant 1 : index
    %c0_21 = arith.constant 0 : index
    %20 = memref.load %arg0[%c1_20, %c0_21] : memref<2x8xi32, #tpu.memory_space<smem>>
    %21 = arith.index_cast %20 : i32 to index
    %c0_22 = arith.constant 0 : index
    %22 = vector.load %arg1[%21, %c0_22] : memref<50x128xf32, #tpu.memory_space<vmem>>, vector<1x128xf32>
    %c5 = arith.constant 5 : index
    %c0_23 = arith.constant 0 : index
    %23 = vector.load %arg6[%c5, %c0_23] : memref<64x128xf32, #tpu.memory_space<vmem>>, vector<1x128xf32>
    tpu.vector_store %arg6[%c5, %c0_23], %22 {strides = array<i32>} : memref<64x128xf32, #tpu.memory_space<vmem>>, vector<1x128xf32>,
    %c1_24 = arith.constant 1 : index
    %c0_25 = arith.constant 0 : index
    %24 = memref.load %arg0[%c1_24, %c0_25] : memref<2x8xi32, #tpu.memory_space<smem>>
    %25 = arith.index_cast %24 : i32 to index
    %c0_26 = arith.constant 0 : index
    %26 = vector.load %arg1[%25, %c0_26] : memref<50x128xf32, #tpu.memory_space<vmem>>, vector<1x128xf32>
    %c6 = arith.constant 6 : index
    %c0_27 = arith.constant 0 : index
    %27 = vector.load %arg6[%c6, %c0_27] : memref<64x128xf32, #tpu.memory_space<vmem>>, vector<1x128xf32>
    tpu.vector_store %arg6[%c6, %c0_27], %26 {strides = array<i32>} : memref<64x128xf32, #tpu.memory_space<vmem>>, vector<1x128xf32>,
    %c1_28 = arith.constant 1 : index
    %c0_29 = arith.constant 0 : index
    %28 = memref.load %arg0[%c1_28, %c0_29] : memref<2x8xi32, #tpu.memory_space<smem>>
    %29 = arith.index_cast %28 : i32 to index
    %c0_30 = arith.constant 0 : index
    %30 = vector.load %arg1[%29, %c0_30] : memref<50x128xf32, #tpu.memory_space<vmem>>, vector<1x128xf32>
    %c7 = arith.constant 7 : index
    %c0_31 = arith.constant 0 : index
    %31 = vector.load %arg6[%c7, %c0_31] : memref<64x128xf32, #tpu.memory_space<vmem>>, vector<1x128xf32>
    tpu.vector_store %arg6[%c7, %c0_31], %30 {strides = array<i32>} : memref<64x128xf32, #tpu.memory_space<vmem>>, vector<1x128xf32>,
    %c0_32 = arith.constant 0 : index
    %c1_33 = arith.constant 1 : index
    %32 = memref.load %arg0[%c0_32, %c1_33] : memref<2x8xi32, #tpu.memory_space<smem>>
    %33 = arith.index_cast %32 : i32 to index
    %c0_34 = arith.constant 0 : index
    %34 = vector.load %arg1[%33, %c0_34] : memref<50x128xf32, #tpu.memory_space<vmem>>, vector<1x128xf32>
    %c8 = arith.constant 8 : index
    %c0_35 = arith.constant 0 : index
    %35 = vector.load %arg6[%c8, %c0_35] : memref<64x128xf32, #tpu.memory_space<vmem>>, vector<1x128xf32>
    tpu.vector_store %arg6[%c8, %c0_35], %34 {strides = array<i32>} : memref<64x128xf32, #tpu.memory_space<vmem>>, vector<1x128xf32>,
    %c1_36 = arith.constant 1 : index
    %c1_37 = arith.constant 1 : index
    %36 = memref.load %arg0[%c1_36, %c1_37] : memref<2x8xi32, #tpu.memory_space<smem>>
    %37 = arith.index_cast %36 : i32 to index
    %c0_38 = arith.constant 0 : index
    %38 = vector.load %arg1[%37, %c0_38] : memref<50x128xf32, #tpu.memory_space<vmem>>, vector<1x128xf32>
    %c9 = arith.constant 9 : index
    %c0_39 = arith.constant 0 : index
    %39 = vector.load %arg6[%c9, %c0_39] : memref<64x128xf32, #tpu.memory_space<vmem>>, vector<1x128xf32>
    tpu.vector_store %arg6[%c9, %c0_39], %38 {strides = array<i32>} : memref<64x128xf32, #tpu.memory_space<vmem>>, vector<1x128xf32>,
    %c1_40 = arith.constant 1 : index
    %c1_41 = arith.constant 1 : index
    %40 = memref.load %arg0[%c1_40, %c1_41] : memref<2x8xi32, #tpu.memory_space<smem>>
    %41 = arith.index_cast %40 : i32 to index
    %c0_42 = arith.constant 0 : index
    %42 = vector.load %arg1[%41, %c0_42] : memref<50x128xf32, #tpu.memory_space<vmem>>, vector<1x128xf32>
    %c10 = arith.constant 10 : index
    %c0_43 = arith.constant 0 : index
    %43 = vector.load %arg6[%c10, %c0_43] : memref<64x128xf32, #tpu.memory_space<vmem>>, vector<1x128xf32>
    tpu.vector_store %arg6[%c10, %c0_43], %42 {strides = array<i32>} : memref<64x128xf32, #tpu.memory_space<vmem>>, vector<1x128xf32>,
    %c1_44 = arith.constant 1 : index
    %c1_45 = arith.constant 1 : index
    %44 = memref.load %arg0[%c1_44, %c1_45] : memref<2x8xi32, #tpu.memory_space<smem>>
    %45 = arith.index_cast %44 : i32 to index
    %c0_46 = arith.constant 0 : index
    %46 = vector.load %arg1[%45, %c0_46] : memref<50x128xf32, #tpu.memory_space<vmem>>, vector<1x128xf32>
    %c11 = arith.constant 11 : index
    %c0_47 = arith.constant 0 : index
    %47 = vector.load %arg6[%c11, %c0_47] : memref<64x128xf32, #tpu.memory_space<vmem>>, vector<1x128xf32>
    tpu.vector_store %arg6[%c11, %c0_47], %46 {strides = array<i32>} : memref<64x128xf32, #tpu.memory_space<vmem>>, vector<1x128xf32>,
    %c1_48 = arith.constant 1 : index
    %c1_49 = arith.constant 1 : index
    %48 = memref.load %arg0[%c1_48, %c1_49] : memref<2x8xi32, #tpu.memory_space<smem>>
    %49 = arith.index_cast %48 : i32 to index
    %c0_50 = arith.constant 0 : index
    %50 = vector.load %arg1[%49, %c0_50] : memref<50x128xf32, #tpu.memory_space<vmem>>, vector<1x128xf32>
    %c12 = arith.constant 12 : index
    %c0_51 = arith.constant 0 : index
    %51 = vector.load %arg6[%c12, %c0_51] : memref<64x128xf32, #tpu.memory_space<vmem>>, vector<1x128xf32>
    tpu.vector_store %arg6[%c12, %c0_51], %50 {strides = array<i32>} : memref<64x128xf32, #tpu.memory_space<vmem>>, vector<1x128xf32>,
    %c1_52 = arith.constant 1 : index
    %c1_53 = arith.constant 1 : index
    %52 = memref.load %arg0[%c1_52, %c1_53] : memref<2x8xi32, #tpu.memory_space<smem>>
    %53 = arith.index_cast %52 : i32 to index
    %c0_54 = arith.constant 0 : index
    %54 = vector.load %arg1[%53, %c0_54] : memref<50x128xf32, #tpu.memory_space<vmem>>, vector<1x128xf32>
    %c13 = arith.constant 13 : index
    %c0_55 = arith.constant 0 : index
    %55 = vector.load %arg6[%c13, %c0_55] : memref<64x128xf32, #tpu.memory_space<vmem>>, vector<1x128xf32>
    tpu.vector_store %arg6[%c13, %c0_55], %54 {strides = array<i32>} : memref<64x128xf32, #tpu.memory_space<vmem>>, vector<1x128xf32>,
    %c1_56 = arith.constant 1 : index
    %c1_57 = arith.constant 1 : index
    %56 = memref.load %arg0[%c1_56, %c1_57] : memref<2x8xi32, #tpu.memory_space<smem>>
    %57 = arith.index_cast %56 : i32 to index
    %c0_58 = arith.constant 0 : index
    %58 = vector.load %arg1[%57, %c0_58] : memref<50x128xf32, #tpu.memory_space<vmem>>, vector<1x128xf32>
    %c14 = arith.constant 14 : index
    %c0_59 = arith.constant 0 : index
    %59 = vector.load %arg6[%c14, %c0_59] : memref<64x128xf32, #tpu.memory_space<vmem>>, vector<1x128xf32>
    tpu.vector_store %arg6[%c14, %c0_59], %58 {strides = array<i32>} : memref<64x128xf32, #tpu.memory_space<vmem>>, vector<1x128xf32>,
    %c1_60 = arith.constant 1 : index
    %c1_61 = arith.constant 1 : index
    %60 = memref.load %arg0[%c1_60, %c1_61] : memref<2x8xi32, #tpu.memory_space<smem>>
    %61 = arith.index_cast %60 : i32 to index
    %c0_62 = arith.constant 0 : index
    %62 = vector.load %arg1[%61, %c0_62] : memref<50x128xf32, #tpu.memory_space<vmem>>, vector<1x128xf32>
    %c15 = arith.constant 15 : index
    %c0_63 = arith.constant 0 : index
    %63 = vector.load %arg6[%c15, %c0_63] : memref<64x128xf32, #tpu.memory_space<vmem>>, vector<1x128xf32>
    tpu.vector_store %arg6[%c15, %c0_63], %62 {strides = array<i32>} : memref<64x128xf32, #tpu.memory_space<vmem>>, vector<1x128xf32>,
    %c0_64 = arith.constant 0 : index
    %c2_65 = arith.constant 2 : index
    %64 = memref.load %arg0[%c0_64, %c2_65] : memref<2x8xi32, #tpu.memory_space<smem>>
    %65 = arith.index_cast %64 : i32 to index
    %c0_66 = arith.constant 0 : index
    %66 = vector.load %arg1[%65, %c0_66] : memref<50x128xf32, #tpu.memory_space<vmem>>, vector<1x128xf32>
    %c16 = arith.constant 16 : index
    %c0_67 = arith.constant 0 : index
    %67 = vector.load %arg6[%c16, %c0_67] : memref<64x128xf32, #tpu.memory_space<vmem>>, vector<1x128xf32>
    tpu.vector_store %arg6[%c16, %c0_67], %66 {strides = array<i32>} : memref<64x128xf32, #tpu.memory_space<vmem>>, vector<1x128xf32>,
    %c1_68 = arith.constant 1 : index
    %c2_69 = arith.constant 2 : index
    %68 = memref.load %arg0[%c1_68, %c2_69] : memref<2x8xi32, #tpu.memory_space<smem>>
    %69 = arith.index_cast %68 : i32 to index
    %c0_70 = arith.constant 0 : index
    %70 = vector.load %arg1[%69, %c0_70] : memref<50x128xf32, #tpu.memory_space<vmem>>, vector<1x128xf32>
    %c17 = arith.constant 17 : index
    %c0_71 = arith.constant 0 : index
    %71 = vector.load %arg6[%c17, %c0_71] : memref<64x128xf32, #tpu.memory_space<vmem>>, vector<1x128xf32>
    tpu.vector_store %arg6[%c17, %c0_71], %70 {strides = array<i32>} : memref<64x128xf32, #tpu.memory_space<vmem>>, vector<1x128xf32>,
    %c1_72 = arith.constant 1 : index
    %c2_73 = arith.constant 2 : index
    %72 = memref.load %arg0[%c1_72, %c2_73] : memref<2x8xi32, #tpu.memory_space<smem>>
    %73 = arith.index_cast %72 : i32 to index
    %c0_74 = arith.constant 0 : index
    %74 = vector.load %arg1[%73, %c0_74] : memref<50x128xf32, #tpu.memory_space<vmem>>, vector<1x128xf32>
    %c18 = arith.constant 18 : index
    %c0_75 = arith.constant 0 : index
    %75 = vector.load %arg6[%c18, %c0_75] : memref<64x128xf32, #tpu.memory_space<vmem>>, vector<1x128xf32>
    tpu.vector_store %arg6[%c18, %c0_75], %74 {strides = array<i32>} : memref<64x128xf32, #tpu.memory_space<vmem>>, vector<1x128xf32>,
    %c1_76 = arith.constant 1 : index
    %c2_77 = arith.constant 2 : index
    %76 = memref.load %arg0[%c1_76, %c2_77] : memref<2x8xi32, #tpu.memory_space<smem>>
    %77 = arith.index_cast %76 : i32 to index
    %c0_78 = arith.constant 0 : index
    %78 = vector.load %arg1[%77, %c0_78] : memref<50x128xf32, #tpu.memory_space<vmem>>, vector<1x128xf32>
    %c19 = arith.constant 19 : index
    %c0_79 = arith.constant 0 : index
    %79 = vector.load %arg6[%c19, %c0_79] : memref<64x128xf32, #tpu.memory_space<vmem>>, vector<1x128xf32>
    tpu.vector_store %arg6[%c19, %c0_79], %78 {strides = array<i32>} : memref<64x128xf32, #tpu.memory_space<vmem>>, vector<1x128xf32>,
    %c1_80 = arith.constant 1 : index
    %c2_81 = arith.constant 2 : index
    %80 = memref.load %arg0[%c1_80, %c2_81] : memref<2x8xi32, #tpu.memory_space<smem>>
    %81 = arith.index_cast %80 : i32 to index
    %c0_82 = arith.constant 0 : index
    %82 = vector.load %arg1[%81, %c0_82] : memref<50x128xf32, #tpu.memory_space<vmem>>, vector<1x128xf32>
    %c20 = arith.constant 20 : index
    %c0_83 = arith.constant 0 : index
    %83 = vector.load %arg6[%c20, %c0_83] : memref<64x128xf32, #tpu.memory_space<vmem>>, vector<1x128xf32>
    tpu.vector_store %arg6[%c20, %c0_83], %82 {strides = array<i32>} : memref<64x128xf32, #tpu.memory_space<vmem>>, vector<1x128xf32>,
    %c1_84 = arith.constant 1 : index
    %c2_85 = arith.constant 2 : index
    %84 = memref.load %arg0[%c1_84, %c2_85] : memref<2x8xi32, #tpu.memory_space<smem>>
    %85 = arith.index_cast %84 : i32 to index
    %c0_86 = arith.constant 0 : index
    %86 = vector.load %arg1[%85, %c0_86] : memref<50x128xf32, #tpu.memory_space<vmem>>, vector<1x128xf32>
    %c21 = arith.constant 21 : index
    %c0_87 = arith.constant 0 : index
    %87 = vector.load %arg6[%c21, %c0_87] : memref<64x128xf32, #tpu.memory_space<vmem>>, vector<1x128xf32>
    tpu.vector_store %arg6[%c21, %c0_87], %86 {strides = array<i32>} : memref<64x128xf32, #tpu.memory_space<vmem>>, vector<1x128xf32>,
    %c1_88 = arith.constant 1 : index
    %c2_89 = arith.constant 2 : index
    %88 = memref.load %arg0[%c1_88, %c2_89] : memref<2x8xi32, #tpu.memory_space<smem>>
    %89 = arith.index_cast %88 : i32 to index
    %c0_90 = arith.constant 0 : index
    %90 = vector.load %arg1[%89, %c0_90] : memref<50x128xf32, #tpu.memory_space<vmem>>, vector<1x128xf32>
    %c22 = arith.constant 22 : index
    %c0_91 = arith.constant 0 : index
    %91 = vector.load %arg6[%c22, %c0_91] : memref<64x128xf32, #tpu.memory_space<vmem>>, vector<1x128xf32>
    tpu.vector_store %arg6[%c22, %c0_91], %90 {strides = array<i32>} : memref<64x128xf32, #tpu.memory_space<vmem>>, vector<1x128xf32>,
    %c1_92 = arith.constant 1 : index
    %c2_93 = arith.constant 2 : index
    %92 = memref.load %arg0[%c1_92, %c2_93] : memref<2x8xi32, #tpu.memory_space<smem>>
    %93 = arith.index_cast %92 : i32 to index
    %c0_94 = arith.constant 0 : index
    %94 = vector.load %arg1[%93, %c0_94] : memref<50x128xf32, #tpu.memory_space<vmem>>, vector<1x128xf32>
    %c23 = arith.constant 23 : index
    %c0_95 = arith.constant 0 : index
    %95 = vector.load %arg6[%c23, %c0_95] : memref<64x128xf32, #tpu.memory_space<vmem>>, vector<1x128xf32>
    tpu.vector_store %arg6[%c23, %c0_95], %94 {strides = array<i32>} : memref<64x128xf32, #tpu.memory_space<vmem>>, vector<1x128xf32>,
    %c0_96 = arith.constant 0 : index
    %c3_97 = arith.constant 3 : index
    %96 = memref.load %arg0[%c0_96, %c3_97] : memref<2x8xi32, #tpu.memory_space<smem>>
    %97 = arith.index_cast %96 : i32 to index
    %c0_98 = arith.constant 0 : index
    %98 = vector.load %arg1[%97, %c0_98] : memref<50x128xf32, #tpu.memory_space<vmem>>, vector<1x128xf32>
    %c24 = arith.constant 24 : index
    %c0_99 = arith.constant 0 : index
    %99 = vector.load %arg6[%c24, %c0_99] : memref<64x128xf32, #tpu.memory_space<vmem>>, vector<1x128xf32>
    tpu.vector_store %arg6[%c24, %c0_99], %98 {strides = array<i32>} : memref<64x128xf32, #tpu.memory_space<vmem>>, vector<1x128xf32>,
    %c1_100 = arith.constant 1 : index
    %c3_101 = arith.constant 3 : index
    %100 = memref.load %arg0[%c1_100, %c3_101] : memref<2x8xi32, #tpu.memory_space<smem>>
    %101 = arith.index_cast %100 : i32 to index
    %c0_102 = arith.constant 0 : index
    %102 = vector.load %arg1[%101, %c0_102] : memref<50x128xf32, #tpu.memory_space<vmem>>, vector<1x128xf32>
    %c25 = arith.constant 25 : index
    %c0_103 = arith.constant 0 : index
    %103 = vector.load %arg6[%c25, %c0_103] : memref<64x128xf32, #tpu.memory_space<vmem>>, vector<1x128xf32>
    tpu.vector_store %arg6[%c25, %c0_103], %102 {strides = array<i32>} : memref<64x128xf32, #tpu.memory_space<vmem>>, vector<1x128xf32>,
    %c1_104 = arith.constant 1 : index
    %c3_105 = arith.constant 3 : index
    %104 = memref.load %arg0[%c1_104, %c3_105] : memref<2x8xi32, #tpu.memory_space<smem>>
    %105 = arith.index_cast %104 : i32 to index
    %c0_106 = arith.constant 0 : index
    %106 = vector.load %arg1[%105, %c0_106] : memref<50x128xf32, #tpu.memory_space<vmem>>, vector<1x128xf32>
    %c26 = arith.constant 26 : index
    %c0_107 = arith.constant 0 : index
    %107 = vector.load %arg6[%c26, %c0_107] : memref<64x128xf32, #tpu.memory_space<vmem>>, vector<1x128xf32>
    tpu.vector_store %arg6[%c26, %c0_107], %106 {strides = array<i32>} : memref<64x128xf32, #tpu.memory_space<vmem>>, vector<1x128xf32>,
    %c1_108 = arith.constant 1 : index
    %c3_109 = arith.constant 3 : index
    %108 = memref.load %arg0[%c1_108, %c3_109] : memref<2x8xi32, #tpu.memory_space<smem>>
    %109 = arith.index_cast %108 : i32 to index
    %c0_110 = arith.constant 0 : index
    %110 = vector.load %arg1[%109, %c0_110] : memref<50x128xf32, #tpu.memory_space<vmem>>, vector<1x128xf32>
    %c27 = arith.constant 27 : index
    %c0_111 = arith.constant 0 : index
    %111 = vector.load %arg6[%c27, %c0_111] : memref<64x128xf32, #tpu.memory_space<vmem>>, vector<1x128xf32>
    tpu.vector_store %arg6[%c27, %c0_111], %110 {strides = array<i32>} : memref<64x128xf32, #tpu.memory_space<vmem>>, vector<1x128xf32>,
    %c1_112 = arith.constant 1 : index
    %c3_113 = arith.constant 3 : index
    %112 = memref.load %arg0[%c1_112, %c3_113] : memref<2x8xi32, #tpu.memory_space<smem>>
    %113 = arith.index_cast %112 : i32 to index
    %c0_114 = arith.constant 0 : index
    %114 = vector.load %arg1[%113, %c0_114] : memref<50x128xf32, #tpu.memory_space<vmem>>, vector<1x128xf32>
    %c28 = arith.constant 28 : index
    %c0_115 = arith.constant 0 : index
    %115 = vector.load %arg6[%c28, %c0_115] : memref<64x128xf32, #tpu.memory_space<vmem>>, vector<1x128xf32>
    tpu.vector_store %arg6[%c28, %c0_115], %114 {strides = array<i32>} : memref<64x128xf32, #tpu.memory_space<vmem>>, vector<1x128xf32>,
    %c1_116 = arith.constant 1 : index
    %c3_117 = arith.constant 3 : index
    %116 = memref.load %arg0[%c1_116, %c3_117] : memref<2x8xi32, #tpu.memory_space<smem>>
    %117 = arith.index_cast %116 : i32 to index
    %c0_118 = arith.constant 0 : index
    %118 = vector.load %arg1[%117, %c0_118] : memref<50x128xf32, #tpu.memory_space<vmem>>, vector<1x128xf32>
    %c29 = arith.constant 29 : index
    %c0_119 = arith.constant 0 : index
    %119 = vector.load %arg6[%c29, %c0_119] : memref<64x128xf32, #tpu.memory_space<vmem>>, vector<1x128xf32>
    tpu.vector_store %arg6[%c29, %c0_119], %118 {strides = array<i32>} : memref<64x128xf32, #tpu.memory_space<vmem>>, vector<1x128xf32>,
    %c1_120 = arith.constant 1 : index
    %c3_121 = arith.constant 3 : index
    %120 = memref.load %arg0[%c1_120, %c3_121] : memref<2x8xi32, #tpu.memory_space<smem>>
    %121 = arith.index_cast %120 : i32 to index
    %c0_122 = arith.constant 0 : index
    %122 = vector.load %arg1[%121, %c0_122] : memref<50x128xf32, #tpu.memory_space<vmem>>, vector<1x128xf32>
    %c30 = arith.constant 30 : index
    %c0_123 = arith.constant 0 : index
    %123 = vector.load %arg6[%c30, %c0_123] : memref<64x128xf32, #tpu.memory_space<vmem>>, vector<1x128xf32>
    tpu.vector_store %arg6[%c30, %c0_123], %122 {strides = array<i32>} : memref<64x128xf32, #tpu.memory_space<vmem>>, vector<1x128xf32>,
    %c1_124 = arith.constant 1 : index
    %c3_125 = arith.constant 3 : index
    %124 = memref.load %arg0[%c1_124, %c3_125] : memref<2x8xi32, #tpu.memory_space<smem>>
    %125 = arith.index_cast %124 : i32 to index
    %c0_126 = arith.constant 0 : index
    %126 = vector.load %arg1[%125, %c0_126] : memref<50x128xf32, #tpu.memory_space<vmem>>, vector<1x128xf32>
    %c31 = arith.constant 31 : index
    %c0_127 = arith.constant 0 : index
    %127 = vector.load %arg6[%c31, %c0_127] : memref<64x128xf32, #tpu.memory_space<vmem>>, vector<1x128xf32>
    tpu.vector_store %arg6[%c31, %c0_127], %126 {strides = array<i32>} : memref<64x128xf32, #tpu.memory_space<vmem>>, vector<1x128xf32>,
    %c0_128 = arith.constant 0 : index
    %c4_129 = arith.constant 4 : index
    %128 = memref.load %arg0[%c0_128, %c4_129] : memref<2x8xi32, #tpu.memory_space<smem>>
    %129 = arith.index_cast %128 : i32 to index
    %c0_130 = arith.constant 0 : index
    %130 = vector.load %arg1[%129, %c0_130] : memref<50x128xf32, #tpu.memory_space<vmem>>, vector<1x128xf32>
    %c32 = arith.constant 32 : index
    %c0_131 = arith.constant 0 : index
    %131 = vector.load %arg6[%c32, %c0_131] : memref<64x128xf32, #tpu.memory_space<vmem>>, vector<1x128xf32>
    tpu.vector_store %arg6[%c32, %c0_131], %130 {strides = array<i32>} : memref<64x128xf32, #tpu.memory_space<vmem>>, vector<1x128xf32>,
    %c1_132 = arith.constant 1 : index
    %c4_133 = arith.constant 4 : index
    %132 = memref.load %arg0[%c1_132, %c4_133] : memref<2x8xi32, #tpu.memory_space<smem>>
    %133 = arith.index_cast %132 : i32 to index
    %c0_134 = arith.constant 0 : index
    %134 = vector.load %arg1[%133, %c0_134] : memref<50x128xf32, #tpu.memory_space<vmem>>, vector<1x128xf32>
    %c33 = arith.constant 33 : index
    %c0_135 = arith.constant 0 : index
    %135 = vector.load %arg6[%c33, %c0_135] : memref<64x128xf32, #tpu.memory_space<vmem>>, vector<1x128xf32>
    tpu.vector_store %arg6[%c33, %c0_135], %134 {strides = array<i32>} : memref<64x128xf32, #tpu.memory_space<vmem>>, vector<1x128xf32>,
    %c1_136 = arith.constant 1 : index
    %c4_137 = arith.constant 4 : index
    %136 = memref.load %arg0[%c1_136, %c4_137] : memref<2x8xi32, #tpu.memory_space<smem>>
    %137 = arith.index_cast %136 : i32 to index
    %c0_138 = arith.constant 0 : index
    %138 = vector.load %arg1[%137, %c0_138] : memref<50x128xf32, #tpu.memory_space<vmem>>, vector<1x128xf32>
    %c34 = arith.constant 34 : index
    %c0_139 = arith.constant 0 : index
    %139 = vector.load %arg6[%c34, %c0_139] : memref<64x128xf32, #tpu.memory_space<vmem>>, vector<1x128xf32>
    tpu.vector_store %arg6[%c34, %c0_139], %138 {strides = array<i32>} : memref<64x128xf32, #tpu.memory_space<vmem>>, vector<1x128xf32>,
    %c1_140 = arith.constant 1 : index
    %c4_141 = arith.constant 4 : index
    %140 = memref.load %arg0[%c1_140, %c4_141] : memref<2x8xi32, #tpu.memory_space<smem>>
    %141 = arith.index_cast %140 : i32 to index
    %c0_142 = arith.constant 0 : index
    %142 = vector.load %arg1[%141, %c0_142] : memref<50x128xf32, #tpu.memory_space<vmem>>, vector<1x128xf32>
    %c35 = arith.constant 35 : index
    %c0_143 = arith.constant 0 : index
    %143 = vector.load %arg6[%c35, %c0_143] : memref<64x128xf32, #tpu.memory_space<vmem>>, vector<1x128xf32>
    tpu.vector_store %arg6[%c35, %c0_143], %142 {strides = array<i32>} : memref<64x128xf32, #tpu.memory_space<vmem>>, vector<1x128xf32>,
    %c1_144 = arith.constant 1 : index
    %c4_145 = arith.constant 4 : index
    %144 = memref.load %arg0[%c1_144, %c4_145] : memref<2x8xi32, #tpu.memory_space<smem>>
    %145 = arith.index_cast %144 : i32 to index
    %c0_146 = arith.constant 0 : index
    %146 = vector.load %arg1[%145, %c0_146] : memref<50x128xf32, #tpu.memory_space<vmem>>, vector<1x128xf32>
    %c36 = arith.constant 36 : index
    %c0_147 = arith.constant 0 : index
    %147 = vector.load %arg6[%c36, %c0_147] : memref<64x128xf32, #tpu.memory_space<vmem>>, vector<1x128xf32>
    tpu.vector_store %arg6[%c36, %c0_147], %146 {strides = array<i32>} : memref<64x128xf32, #tpu.memory_space<vmem>>, vector<1x128xf32>,
    %c1_148 = arith.constant 1 : index
    %c4_149 = arith.constant 4 : index
    %148 = memref.load %arg0[%c1_148, %c4_149] : memref<2x8xi32, #tpu.memory_space<smem>>
    %149 = arith.index_cast %148 : i32 to index
    %c0_150 = arith.constant 0 : index
    %150 = vector.load %arg1[%149, %c0_150] : memref<50x128xf32, #tpu.memory_space<vmem>>, vector<1x128xf32>
    %c37 = arith.constant 37 : index
    %c0_151 = arith.constant 0 : index
    %151 = vector.load %arg6[%c37, %c0_151] : memref<64x128xf32, #tpu.memory_space<vmem>>, vector<1x128xf32>
    tpu.vector_store %arg6[%c37, %c0_151], %150 {strides = array<i32>} : memref<64x128xf32, #tpu.memory_space<vmem>>, vector<1x128xf32>,
    %c1_152 = arith.constant 1 : index
    %c4_153 = arith.constant 4 : index
    %152 = memref.load %arg0[%c1_152, %c4_153] : memref<2x8xi32, #tpu.memory_space<smem>>
    %153 = arith.index_cast %152 : i32 to index
    %c0_154 = arith.constant 0 : index
    %154 = vector.load %arg1[%153, %c0_154] : memref<50x128xf32, #tpu.memory_space<vmem>>, vector<1x128xf32>
    %c38 = arith.constant 38 : index
    %c0_155 = arith.constant 0 : index
    %155 = vector.load %arg6[%c38, %c0_155] : memref<64x128xf32, #tpu.memory_space<vmem>>, vector<1x128xf32>
    tpu.vector_store %arg6[%c38, %c0_155], %154 {strides = array<i32>} : memref<64x128xf32, #tpu.memory_space<vmem>>, vector<1x128xf32>,
    %c1_156 = arith.constant 1 : index
    %c4_157 = arith.constant 4 : index
    %156 = memref.load %arg0[%c1_156, %c4_157] : memref<2x8xi32, #tpu.memory_space<smem>>
    %157 = arith.index_cast %156 : i32 to index
    %c0_158 = arith.constant 0 : index
    %158 = vector.load %arg1[%157, %c0_158] : memref<50x128xf32, #tpu.memory_space<vmem>>, vector<1x128xf32>
    %c39 = arith.constant 39 : index
    %c0_159 = arith.constant 0 : index
    %159 = vector.load %arg6[%c39, %c0_159] : memref<64x128xf32, #tpu.memory_space<vmem>>, vector<1x128xf32>
    tpu.vector_store %arg6[%c39, %c0_159], %158 {strides = array<i32>} : memref<64x128xf32, #tpu.memory_space<vmem>>, vector<1x128xf32>,
    %c0_160 = arith.constant 0 : index
    %c5_161 = arith.constant 5 : index
    %160 = memref.load %arg0[%c0_160, %c5_161] : memref<2x8xi32, #tpu.memory_space<smem>>
    %161 = arith.index_cast %160 : i32 to index
    %c0_162 = arith.constant 0 : index
    %162 = vector.load %arg1[%161, %c0_162] : memref<50x128xf32, #tpu.memory_space<vmem>>, vector<1x128xf32>
    %c40 = arith.constant 40 : index
    %c0_163 = arith.constant 0 : index
    %163 = vector.load %arg6[%c40, %c0_163] : memref<64x128xf32, #tpu.memory_space<vmem>>, vector<1x128xf32>
    tpu.vector_store %arg6[%c40, %c0_163], %162 {strides = array<i32>} : memref<64x128xf32, #tpu.memory_space<vmem>>, vector<1x128xf32>,
    %c1_164 = arith.constant 1 : index
    %c5_165 = arith.constant 5 : index
    %164 = memref.load %arg0[%c1_164, %c5_165] : memref<2x8xi32, #tpu.memory_space<smem>>
    %165 = arith.index_cast %164 : i32 to index
    %c0_166 = arith.constant 0 : index
    %166 = vector.load %arg1[%165, %c0_166] : memref<50x128xf32, #tpu.memory_space<vmem>>, vector<1x128xf32>
    %c41 = arith.constant 41 : index
    %c0_167 = arith.constant 0 : index
    %167 = vector.load %arg6[%c41, %c0_167] : memref<64x128xf32, #tpu.memory_space<vmem>>, vector<1x128xf32>
    tpu.vector_store %arg6[%c41, %c0_167], %166 {strides = array<i32>} : memref<64x128xf32, #tpu.memory_space<vmem>>, vector<1x128xf32>,
    %c1_168 = arith.constant 1 : index
    %c5_169 = arith.constant 5 : index
    %168 = memref.load %arg0[%c1_168, %c5_169] : memref<2x8xi32, #tpu.memory_space<smem>>
    %169 = arith.index_cast %168 : i32 to index
    %c0_170 = arith.constant 0 : index
    %170 = vector.load %arg1[%169, %c0_170] : memref<50x128xf32, #tpu.memory_space<vmem>>, vector<1x128xf32>
    %c42 = arith.constant 42 : index
    %c0_171 = arith.constant 0 : index
    %171 = vector.load %arg6[%c42, %c0_171] : memref<64x128xf32, #tpu.memory_space<vmem>>, vector<1x128xf32>
    tpu.vector_store %arg6[%c42, %c0_171], %170 {strides = array<i32>} : memref<64x128xf32, #tpu.memory_space<vmem>>, vector<1x128xf32>,
    %c1_172 = arith.constant 1 : index
    %c5_173 = arith.constant 5 : index
    %172 = memref.load %arg0[%c1_172, %c5_173] : memref<2x8xi32, #tpu.memory_space<smem>>
    %173 = arith.index_cast %172 : i32 to index
    %c0_174 = arith.constant 0 : index
    %174 = vector.load %arg1[%173, %c0_174] : memref<50x128xf32, #tpu.memory_space<vmem>>, vector<1x128xf32>
    %c43 = arith.constant 43 : index
    %c0_175 = arith.constant 0 : index
    %175 = vector.load %arg6[%c43, %c0_175] : memref<64x128xf32, #tpu.memory_space<vmem>>, vector<1x128xf32>
    tpu.vector_store %arg6[%c43, %c0_175], %174 {strides = array<i32>} : memref<64x128xf32, #tpu.memory_space<vmem>>, vector<1x128xf32>,
    %c1_176 = arith.constant 1 : index
    %c5_177 = arith.constant 5 : index
    %176 = memref.load %arg0[%c1_176, %c5_177] : memref<2x8xi32, #tpu.memory_space<smem>>
    %177 = arith.index_cast %176 : i32 to index
    %c0_178 = arith.constant 0 : index
    %178 = vector.load %arg1[%177, %c0_178] : memref<50x128xf32, #tpu.memory_space<vmem>>, vector<1x128xf32>
    %c44 = arith.constant 44 : index
    %c0_179 = arith.constant 0 : index
    %179 = vector.load %arg6[%c44, %c0_179] : memref<64x128xf32, #tpu.memory_space<vmem>>, vector<1x128xf32>
    tpu.vector_store %arg6[%c44, %c0_179], %178 {strides = array<i32>} : memref<64x128xf32, #tpu.memory_space<vmem>>, vector<1x128xf32>,
    %c1_180 = arith.constant 1 : index
    %c5_181 = arith.constant 5 : index
    %180 = memref.load %arg0[%c1_180, %c5_181] : memref<2x8xi32, #tpu.memory_space<smem>>
    %181 = arith.index_cast %180 : i32 to index
    %c0_182 = arith.constant 0 : index
    %182 = vector.load %arg1[%181, %c0_182] : memref<50x128xf32, #tpu.memory_space<vmem>>, vector<1x128xf32>
    %c45 = arith.constant 45 : index
    %c0_183 = arith.constant 0 : index
    %183 = vector.load %arg6[%c45, %c0_183] : memref<64x128xf32, #tpu.memory_space<vmem>>, vector<1x128xf32>
    tpu.vector_store %arg6[%c45, %c0_183], %182 {strides = array<i32>} : memref<64x128xf32, #tpu.memory_space<vmem>>, vector<1x128xf32>,
    %c1_184 = arith.constant 1 : index
    %c5_185 = arith.constant 5 : index
    %184 = memref.load %arg0[%c1_184, %c5_185] : memref<2x8xi32, #tpu.memory_space<smem>>
    %185 = arith.index_cast %184 : i32 to index
    %c0_186 = arith.constant 0 : index
    %186 = vector.load %arg1[%185, %c0_186] : memref<50x128xf32, #tpu.memory_space<vmem>>, vector<1x128xf32>
    %c46 = arith.constant 46 : index
    %c0_187 = arith.constant 0 : index
    %187 = vector.load %arg6[%c46, %c0_187] : memref<64x128xf32, #tpu.memory_space<vmem>>, vector<1x128xf32>
    tpu.vector_store %arg6[%c46, %c0_187], %186 {strides = array<i32>} : memref<64x128xf32, #tpu.memory_space<vmem>>, vector<1x128xf32>,
    %c1_188 = arith.constant 1 : index
    %c5_189 = arith.constant 5 : index
    %188 = memref.load %arg0[%c1_188, %c5_189] : memref<2x8xi32, #tpu.memory_space<smem>>
    %189 = arith.index_cast %188 : i32 to index
    %c0_190 = arith.constant 0 : index
    %190 = vector.load %arg1[%189, %c0_190] : memref<50x128xf32, #tpu.memory_space<vmem>>, vector<1x128xf32>
    %c47 = arith.constant 47 : index
    %c0_191 = arith.constant 0 : index
    %191 = vector.load %arg6[%c47, %c0_191] : memref<64x128xf32, #tpu.memory_space<vmem>>, vector<1x128xf32>
    tpu.vector_store %arg6[%c47, %c0_191], %190 {strides = array<i32>} : memref<64x128xf32, #tpu.memory_space<vmem>>, vector<1x128xf32>,
    %c0_192 = arith.constant 0 : index
    %c6_193 = arith.constant 6 : index
    %192 = memref.load %arg0[%c0_192, %c6_193] : memref<2x8xi32, #tpu.memory_space<smem>>
    %193 = arith.index_cast %192 : i32 to index
    %c0_194 = arith.constant 0 : index
    %194 = vector.load %arg1[%193, %c0_194] : memref<50x128xf32, #tpu.memory_space<vmem>>, vector<1x128xf32>
    %c48 = arith.constant 48 : index
    %c0_195 = arith.constant 0 : index
    %195 = vector.load %arg6[%c48, %c0_195] : memref<64x128xf32, #tpu.memory_space<vmem>>, vector<1x128xf32>
    tpu.vector_store %arg6[%c48, %c0_195], %194 {strides = array<i32>} : memref<64x128xf32, #tpu.memory_space<vmem>>, vector<1x128xf32>,
    %c1_196 = arith.constant 1 : index
    %c6_197 = arith.constant 6 : index
    %196 = memref.load %arg0[%c1_196, %c6_197] : memref<2x8xi32, #tpu.memory_space<smem>>
    %197 = arith.index_cast %196 : i32 to index
    %c0_198 = arith.constant 0 : index
    %198 = vector.load %arg1[%197, %c0_198] : memref<50x128xf32, #tpu.memory_space<vmem>>, vector<1x128xf32>
    %c49 = arith.constant 49 : index
    %c0_199 = arith.constant 0 : index
    %199 = vector.load %arg6[%c49, %c0_199] : memref<64x128xf32, #tpu.memory_space<vmem>>, vector<1x128xf32>
    tpu.vector_store %arg6[%c49, %c0_199], %198 {strides = array<i32>} : memref<64x128xf32, #tpu.memory_space<vmem>>, vector<1x128xf32>,
    %c1_200 = arith.constant 1 : index
    %c6_201 = arith.constant 6 : index
    %200 = memref.load %arg0[%c1_200, %c6_201] : memref<2x8xi32, #tpu.memory_space<smem>>
    %201 = arith.index_cast %200 : i32 to index
    %c0_202 = arith.constant 0 : index
    %202 = vector.load %arg1[%201, %c0_202] : memref<50x128xf32, #tpu.memory_space<vmem>>, vector<1x128xf32>
    %c50 = arith.constant 50 : index
    %c0_203 = arith.constant 0 : index
    %203 = vector.load %arg6[%c50, %c0_203] : memref<64x128xf32, #tpu.memory_space<vmem>>, vector<1x128xf32>
    tpu.vector_store %arg6[%c50, %c0_203], %202 {strides = array<i32>} : memref<64x128xf32, #tpu.memory_space<vmem>>, vector<1x128xf32>,
    %c1_204 = arith.constant 1 : index
    %c6_205 = arith.constant 6 : index
    %204 = memref.load %arg0[%c1_204, %c6_205] : memref<2x8xi32, #tpu.memory_space<smem>>
    %205 = arith.index_cast %204 : i32 to index
    %c0_206 = arith.constant 0 : index
    %206 = vector.load %arg1[%205, %c0_206] : memref<50x128xf32, #tpu.memory_space<vmem>>, vector<1x128xf32>
    %c51 = arith.constant 51 : index
    %c0_207 = arith.constant 0 : index
    %207 = vector.load %arg6[%c51, %c0_207] : memref<64x128xf32, #tpu.memory_space<vmem>>, vector<1x128xf32>
    tpu.vector_store %arg6[%c51, %c0_207], %206 {strides = array<i32>} : memref<64x128xf32, #tpu.memory_space<vmem>>, vector<1x128xf32>,
    %c1_208 = arith.constant 1 : index
    %c6_209 = arith.constant 6 : index
    %208 = memref.load %arg0[%c1_208, %c6_209] : memref<2x8xi32, #tpu.memory_space<smem>>
    %209 = arith.index_cast %208 : i32 to index
    %c0_210 = arith.constant 0 : index
    %210 = vector.load %arg1[%209, %c0_210] : memref<50x128xf32, #tpu.memory_space<vmem>>, vector<1x128xf32>
    %c52 = arith.constant 52 : index
    %c0_211 = arith.constant 0 : index
    %211 = vector.load %arg6[%c52, %c0_211] : memref<64x128xf32, #tpu.memory_space<vmem>>, vector<1x128xf32>
    tpu.vector_store %arg6[%c52, %c0_211], %210 {strides = array<i32>} : memref<64x128xf32, #tpu.memory_space<vmem>>, vector<1x128xf32>,
    %c1_212 = arith.constant 1 : index
    %c6_213 = arith.constant 6 : index
    %212 = memref.load %arg0[%c1_212, %c6_213] : memref<2x8xi32, #tpu.memory_space<smem>>
    %213 = arith.index_cast %212 : i32 to index
    %c0_214 = arith.constant 0 : index
    %214 = vector.load %arg1[%213, %c0_214] : memref<50x128xf32, #tpu.memory_space<vmem>>, vector<1x128xf32>
    %c53 = arith.constant 53 : index
    %c0_215 = arith.constant 0 : index
    %215 = vector.load %arg6[%c53, %c0_215] : memref<64x128xf32, #tpu.memory_space<vmem>>, vector<1x128xf32>
    tpu.vector_store %arg6[%c53, %c0_215], %214 {strides = array<i32>} : memref<64x128xf32, #tpu.memory_space<vmem>>, vector<1x128xf32>,
    %c1_216 = arith.constant 1 : index
    %c6_217 = arith.constant 6 : index
    %216 = memref.load %arg0[%c1_216, %c6_217] : memref<2x8xi32, #tpu.memory_space<smem>>
    %217 = arith.index_cast %216 : i32 to index
    %c0_218 = arith.constant 0 : index
    %218 = vector.load %arg1[%217, %c0_218] : memref<50x128xf32, #tpu.memory_space<vmem>>, vector<1x128xf32>
    %c54 = arith.constant 54 : index
    %c0_219 = arith.constant 0 : index
    %219 = vector.load %arg6[%c54, %c0_219] : memref<64x128xf32, #tpu.memory_space<vmem>>, vector<1x128xf32>
    tpu.vector_store %arg6[%c54, %c0_219], %218 {strides = array<i32>} : memref<64x128xf32, #tpu.memory_space<vmem>>, vector<1x128xf32>,
    %c1_220 = arith.constant 1 : index
    %c6_221 = arith.constant 6 : index
    %220 = memref.load %arg0[%c1_220, %c6_221] : memref<2x8xi32, #tpu.memory_space<smem>>
    %221 = arith.index_cast %220 : i32 to index
    %c0_222 = arith.constant 0 : index
    %222 = vector.load %arg1[%221, %c0_222] : memref<50x128xf32, #tpu.memory_space<vmem>>, vector<1x128xf32>
    %c55 = arith.constant 55 : index
    %c0_223 = arith.constant 0 : index
    %223 = vector.load %arg6[%c55, %c0_223] : memref<64x128xf32, #tpu.memory_space<vmem>>, vector<1x128xf32>
    tpu.vector_store %arg6[%c55, %c0_223], %222 {strides = array<i32>} : memref<64x128xf32, #tpu.memory_space<vmem>>, vector<1x128xf32>,
    %c0_224 = arith.constant 0 : index
    %c7_225 = arith.constant 7 : index
    %224 = memref.load %arg0[%c0_224, %c7_225] : memref<2x8xi32, #tpu.memory_space<smem>>
    %225 = arith.index_cast %224 : i32 to index
    %c0_226 = arith.constant 0 : index
    %226 = vector.load %arg1[%225, %c0_226] : memref<50x128xf32, #tpu.memory_space<vmem>>, vector<1x128xf32>
    %c56 = arith.constant 56 : index
    %c0_227 = arith.constant 0 : index
    %227 = vector.load %arg6[%c56, %c0_227] : memref<64x128xf32, #tpu.memory_space<vmem>>, vector<1x128xf32>
    tpu.vector_store %arg6[%c56, %c0_227], %226 {strides = array<i32>} : memref<64x128xf32, #tpu.memory_space<vmem>>, vector<1x128xf32>,
    %c1_228 = arith.constant 1 : index
    %c7_229 = arith.constant 7 : index
    %228 = memref.load %arg0[%c1_228, %c7_229] : memref<2x8xi32, #tpu.memory_space<smem>>
    %229 = arith.index_cast %228 : i32 to index
    %c0_230 = arith.constant 0 : index
    %230 = vector.load %arg1[%229, %c0_230] : memref<50x128xf32, #tpu.memory_space<vmem>>, vector<1x128xf32>
    %c57 = arith.constant 57 : index
    %c0_231 = arith.constant 0 : index
    %231 = vector.load %arg6[%c57, %c0_231] : memref<64x128xf32, #tpu.memory_space<vmem>>, vector<1x128xf32>
    tpu.vector_store %arg6[%c57, %c0_231], %230 {strides = array<i32>} : memref<64x128xf32, #tpu.memory_space<vmem>>, vector<1x128xf32>,
    %c1_232 = arith.constant 1 : index
    %c7_233 = arith.constant 7 : index
    %232 = memref.load %arg0[%c1_232, %c7_233] : memref<2x8xi32, #tpu.memory_space<smem>>
    %233 = arith.index_cast %232 : i32 to index
    %c0_234 = arith.constant 0 : index
    %234 = vector.load %arg1[%233, %c0_234] : memref<50x128xf32, #tpu.memory_space<vmem>>, vector<1x128xf32>
    %c58 = arith.constant 58 : index
    %c0_235 = arith.constant 0 : index
    %235 = vector.load %arg6[%c58, %c0_235] : memref<64x128xf32, #tpu.memory_space<vmem>>, vector<1x128xf32>
    tpu.vector_store %arg6[%c58, %c0_235], %234 {strides = array<i32>} : memref<64x128xf32, #tpu.memory_space<vmem>>, vector<1x128xf32>,
    %c1_236 = arith.constant 1 : index
    %c7_237 = arith.constant 7 : index
    %236 = memref.load %arg0[%c1_236, %c7_237] : memref<2x8xi32, #tpu.memory_space<smem>>
    %237 = arith.index_cast %236 : i32 to index
    %c0_238 = arith.constant 0 : index
    %238 = vector.load %arg1[%237, %c0_238] : memref<50x128xf32, #tpu.memory_space<vmem>>, vector<1x128xf32>
    %c59 = arith.constant 59 : index
    %c0_239 = arith.constant 0 : index
    %239 = vector.load %arg6[%c59, %c0_239] : memref<64x128xf32, #tpu.memory_space<vmem>>, vector<1x128xf32>
    tpu.vector_store %arg6[%c59, %c0_239], %238 {strides = array<i32>} : memref<64x128xf32, #tpu.memory_space<vmem>>, vector<1x128xf32>,
    %c1_240 = arith.constant 1 : index
    %c7_241 = arith.constant 7 : index
    %240 = memref.load %arg0[%c1_240, %c7_241] : memref<2x8xi32, #tpu.memory_space<smem>>
    %241 = arith.index_cast %240 : i32 to index
    %c0_242 = arith.constant 0 : index
    %242 = vector.load %arg1[%241, %c0_242] : memref<50x128xf32, #tpu.memory_space<vmem>>, vector<1x128xf32>
    %c60 = arith.constant 60 : index
    %c0_243 = arith.constant 0 : index
    %243 = vector.load %arg6[%c60, %c0_243] : memref<64x128xf32, #tpu.memory_space<vmem>>, vector<1x128xf32>
    tpu.vector_store %arg6[%c60, %c0_243], %242 {strides = array<i32>} : memref<64x128xf32, #tpu.memory_space<vmem>>, vector<1x128xf32>,
    %c1_244 = arith.constant 1 : index
    %c7_245 = arith.constant 7 : index
    %244 = memref.load %arg0[%c1_244, %c7_245] : memref<2x8xi32, #tpu.memory_space<smem>>
    %245 = arith.index_cast %244 : i32 to index
    %c0_246 = arith.constant 0 : index
    %246 = vector.load %arg1[%245, %c0_246] : memref<50x128xf32, #tpu.memory_space<vmem>>, vector<1x128xf32>
    %c61 = arith.constant 61 : index
    %c0_247 = arith.constant 0 : index
    %247 = vector.load %arg6[%c61, %c0_247] : memref<64x128xf32, #tpu.memory_space<vmem>>, vector<1x128xf32>
    tpu.vector_store %arg6[%c61, %c0_247], %246 {strides = array<i32>} : memref<64x128xf32, #tpu.memory_space<vmem>>, vector<1x128xf32>,
    %c1_248 = arith.constant 1 : index
    %c7_249 = arith.constant 7 : index
    %248 = memref.load %arg0[%c1_248, %c7_249] : memref<2x8xi32, #tpu.memory_space<smem>>
    %249 = arith.index_cast %248 : i32 to index
    %c0_250 = arith.constant 0 : index
    %250 = vector.load %arg1[%249, %c0_250] : memref<50x128xf32, #tpu.memory_space<vmem>>, vector<1x128xf32>
    %c62 = arith.constant 62 : index
    %c0_251 = arith.constant 0 : index
    %251 = vector.load %arg6[%c62, %c0_251] : memref<64x128xf32, #tpu.memory_space<vmem>>, vector<1x128xf32>
    tpu.vector_store %arg6[%c62, %c0_251], %250 {strides = array<i32>} : memref<64x128xf32, #tpu.memory_space<vmem>>, vector<1x128xf32>,
    %c1_252 = arith.constant 1 : index
    %c7_253 = arith.constant 7 : index
    %252 = memref.load %arg0[%c1_252, %c7_253] : memref<2x8xi32, #tpu.memory_space<smem>>
    %253 = arith.index_cast %252 : i32 to index
    %c0_254 = arith.constant 0 : index
    %254 = vector.load %arg1[%253, %c0_254] : memref<50x128xf32, #tpu.memory_space<vmem>>, vector<1x128xf32>
    %c63 = arith.constant 63 : index
    %c0_255 = arith.constant 0 : index
    %255 = vector.load %arg6[%c63, %c0_255] : memref<64x128xf32, #tpu.memory_space<vmem>>, vector<1x128xf32>
    tpu.vector_store %arg6[%c63, %c0_255], %254 {strides = array<i32>} : memref<64x128xf32, #tpu.memory_space<vmem>>, vector<1x128xf32>,
    %c0_256 = arith.constant 0 : index
    %c0_257 = arith.constant 0 : index
    %256 = vector.load %arg2[%c0_256, %c0_257] : memref<32x128xbf16, #tpu.memory_space<vmem>>, vector<32x128xbf16>
    %cst = arith.constant 0.000000e+00 : f32
    %257 = vector.broadcast %cst : f32 to vector<8x32xf32>
    %cst_258 = arith.constant 0.000000e+00 : f32
    %258 = vector.broadcast %cst_258 : f32 to vector<8x32xf32>
    %c0_259 = arith.constant 0 : index
    %c0_260 = arith.constant 0 : index
    %259 = vector.load %arg6[%c0_259, %c0_260] : memref<64x128xf32, #tpu.memory_space<vmem>>, vector<8x128xf32>
    %260 = arith.truncf %257 : vector<8x32xf32> to vector<8x32xbf16>
    %cst_261 = arith.constant dense<0.000000e+00> : vector<8x128xf32>
    %261 = tpu.matmul %260, %256, %cst_261 {dimension_numbers = #tpu.dot_dimension_numbers<[1], [0], [0], [1], [0, 0, 1, 1], [], []>} : vector<8x32xbf16>, vector<32x128xbf16>, vector<8x128xf32> -> vector<8x128xf32>
    %262 = arith.addf %259, %261 : vector<8x128xf32>
    %cst_262 = arith.constant 5.000000e-01 : f32
    %263 = vector.broadcast %cst_262 : f32 to vector<8x128xf32>
    %264 = arith.mulf %263, %262 : vector<8x128xf32>
    %265 = math.tanh %264 : vector<8x128xf32>
    %cst_263 = arith.constant 5.000000e-01 : f32
    %266 = vector.broadcast %cst_263 : f32 to vector<8x128xf32>
    %267 = arith.mulf %266, %265 : vector<8x128xf32>
    %cst_264 = arith.constant 5.000000e-01 : f32
    %268 = vector.broadcast %cst_264 : f32 to vector<8x128xf32>
    %269 = arith.addf %267, %268 : vector<8x128xf32>
    %270 = math.tanh %262 : vector<8x128xf32>
    %271 = vector.extract_strided_slice %269 {offsets = [0, 0], sizes = [8, 32], strides = [1, 1]} : vector<8x128xf32> to vector<8x32xf32>
    %272 = vector.extract_strided_slice %269 {offsets = [0, 32], sizes = [8, 32], strides = [1, 1]} : vector<8x128xf32> to vector<8x32xf32>
    %273 = vector.extract_strided_slice %270 {offsets = [0, 64], sizes = [8, 32], strides = [1, 1]} : vector<8x128xf32> to vector<8x32xf32>
    %274 = vector.extract_strided_slice %269 {offsets = [0, 96], sizes = [8, 32], strides = [1, 1]} : vector<8x128xf32> to vector<8x32xf32>
    %275 = arith.mulf %272, %258 : vector<8x32xf32>
    %276 = arith.mulf %271, %273 : vector<8x32xf32>
    %277 = arith.addf %275, %276 : vector<8x32xf32>
    %278 = math.tanh %277 : vector<8x32xf32>
    %279 = arith.mulf %274, %278 : vector<8x32xf32>
    %c8_265 = arith.constant 8 : index
    %c0_266 = arith.constant 0 : index
    %280 = vector.load %arg6[%c8_265, %c0_266] : memref<64x128xf32, #tpu.memory_space<vmem>>, vector<8x128xf32>
    %281 = arith.truncf %279 : vector<8x32xf32> to vector<8x32xbf16>
    %cst_267 = arith.constant dense<0.000000e+00> : vector<8x128xf32>
    %282 = tpu.matmul %281, %256, %cst_267 {dimension_numbers = #tpu.dot_dimension_numbers<[1], [0], [0], [1], [0, 0, 1, 1], [], []>} : vector<8x32xbf16>, vector<32x128xbf16>, vector<8x128xf32> -> vector<8x128xf32>
    %283 = arith.addf %280, %282 : vector<8x128xf32>
    %cst_268 = arith.constant 5.000000e-01 : f32
    %284 = vector.broadcast %cst_268 : f32 to vector<8x128xf32>
    %285 = arith.mulf %284, %283 : vector<8x128xf32>
    %286 = math.tanh %285 : vector<8x128xf32>
    %cst_269 = arith.constant 5.000000e-01 : f32
    %287 = vector.broadcast %cst_269 : f32 to vector<8x128xf32>
    %288 = arith.mulf %287, %286 : vector<8x128xf32>
    %cst_270 = arith.constant 5.000000e-01 : f32
    %289 = vector.broadcast %cst_270 : f32 to vector<8x128xf32>
    %290 = arith.addf %288, %289 : vector<8x128xf32>
    %291 = math.tanh %283 : vector<8x128xf32>
    %292 = vector.extract_strided_slice %290 {offsets = [0, 0], sizes = [8, 32], strides = [1, 1]} : vector<8x128xf32> to vector<8x32xf32>
    %293 = vector.extract_strided_slice %290 {offsets = [0, 32], sizes = [8, 32], strides = [1, 1]} : vector<8x128xf32> to vector<8x32xf32>
    %294 = vector.extract_strided_slice %291 {offsets = [0, 64], sizes = [8, 32], strides = [1, 1]} : vector<8x128xf32> to vector<8x32xf32>
    %295 = vector.extract_strided_slice %290 {offsets = [0, 96], sizes = [8, 32], strides = [1, 1]} : vector<8x128xf32> to vector<8x32xf32>
    %296 = arith.mulf %293, %277 : vector<8x32xf32>
    %297 = arith.mulf %292, %294 : vector<8x32xf32>
    %298 = arith.addf %296, %297 : vector<8x32xf32>
    %299 = math.tanh %298 : vector<8x32xf32>
    %300 = arith.mulf %295, %299 : vector<8x32xf32>
    %c16_271 = arith.constant 16 : index
    %c0_272 = arith.constant 0 : index
    %301 = vector.load %arg6[%c16_271, %c0_272] : memref<64x128xf32, #tpu.memory_space<vmem>>, vector<8x128xf32>
    %302 = arith.truncf %300 : vector<8x32xf32> to vector<8x32xbf16>
    %cst_273 = arith.constant dense<0.000000e+00> : vector<8x128xf32>
    %303 = tpu.matmul %302, %256, %cst_273 {dimension_numbers = #tpu.dot_dimension_numbers<[1], [0], [0], [1], [0, 0, 1, 1], [], []>} : vector<8x32xbf16>, vector<32x128xbf16>, vector<8x128xf32> -> vector<8x128xf32>
    %304 = arith.addf %301, %303 : vector<8x128xf32>
    %cst_274 = arith.constant 5.000000e-01 : f32
    %305 = vector.broadcast %cst_274 : f32 to vector<8x128xf32>
    %306 = arith.mulf %305, %304 : vector<8x128xf32>
    %307 = math.tanh %306 : vector<8x128xf32>
    %cst_275 = arith.constant 5.000000e-01 : f32
    %308 = vector.broadcast %cst_275 : f32 to vector<8x128xf32>
    %309 = arith.mulf %308, %307 : vector<8x128xf32>
    %cst_276 = arith.constant 5.000000e-01 : f32
    %310 = vector.broadcast %cst_276 : f32 to vector<8x128xf32>
    %311 = arith.addf %309, %310 : vector<8x128xf32>
    %312 = math.tanh %304 : vector<8x128xf32>
    %313 = vector.extract_strided_slice %311 {offsets = [0, 0], sizes = [8, 32], strides = [1, 1]} : vector<8x128xf32> to vector<8x32xf32>
    %314 = vector.extract_strided_slice %311 {offsets = [0, 32], sizes = [8, 32], strides = [1, 1]} : vector<8x128xf32> to vector<8x32xf32>
    %315 = vector.extract_strided_slice %312 {offsets = [0, 64], sizes = [8, 32], strides = [1, 1]} : vector<8x128xf32> to vector<8x32xf32>
    %316 = vector.extract_strided_slice %311 {offsets = [0, 96], sizes = [8, 32], strides = [1, 1]} : vector<8x128xf32> to vector<8x32xf32>
    %317 = arith.mulf %314, %298 : vector<8x32xf32>
    %318 = arith.mulf %313, %315 : vector<8x32xf32>
    %319 = arith.addf %317, %318 : vector<8x32xf32>
    %320 = math.tanh %319 : vector<8x32xf32>
    %321 = arith.mulf %316, %320 : vector<8x32xf32>
    %c24_277 = arith.constant 24 : index
    %c0_278 = arith.constant 0 : index
    %322 = vector.load %arg6[%c24_277, %c0_278] : memref<64x128xf32, #tpu.memory_space<vmem>>, vector<8x128xf32>
    %323 = arith.truncf %321 : vector<8x32xf32> to vector<8x32xbf16>
    %cst_279 = arith.constant dense<0.000000e+00> : vector<8x128xf32>
    %324 = tpu.matmul %323, %256, %cst_279 {dimension_numbers = #tpu.dot_dimension_numbers<[1], [0], [0], [1], [0, 0, 1, 1], [], []>} : vector<8x32xbf16>, vector<32x128xbf16>, vector<8x128xf32> -> vector<8x128xf32>
    %325 = arith.addf %322, %324 : vector<8x128xf32>
    %cst_280 = arith.constant 5.000000e-01 : f32
    %326 = vector.broadcast %cst_280 : f32 to vector<8x128xf32>
    %327 = arith.mulf %326, %325 : vector<8x128xf32>
    %328 = math.tanh %327 : vector<8x128xf32>
    %cst_281 = arith.constant 5.000000e-01 : f32
    %329 = vector.broadcast %cst_281 : f32 to vector<8x128xf32>
    %330 = arith.mulf %329, %328 : vector<8x128xf32>
    %cst_282 = arith.constant 5.000000e-01 : f32
    %331 = vector.broadcast %cst_282 : f32 to vector<8x128xf32>
    %332 = arith.addf %330, %331 : vector<8x128xf32>
    %333 = math.tanh %325 : vector<8x128xf32>
    %334 = vector.extract_strided_slice %332 {offsets = [0, 0], sizes = [8, 32], strides = [1, 1]} : vector<8x128xf32> to vector<8x32xf32>
    %335 = vector.extract_strided_slice %332 {offsets = [0, 32], sizes = [8, 32], strides = [1, 1]} : vector<8x128xf32> to vector<8x32xf32>
    %336 = vector.extract_strided_slice %333 {offsets = [0, 64], sizes = [8, 32], strides = [1, 1]} : vector<8x128xf32> to vector<8x32xf32>
    %337 = vector.extract_strided_slice %332 {offsets = [0, 96], sizes = [8, 32], strides = [1, 1]} : vector<8x128xf32> to vector<8x32xf32>
    %338 = arith.mulf %335, %319 : vector<8x32xf32>
    %339 = arith.mulf %334, %336 : vector<8x32xf32>
    %340 = arith.addf %338, %339 : vector<8x32xf32>
    %341 = math.tanh %340 : vector<8x32xf32>
    %342 = arith.mulf %337, %341 : vector<8x32xf32>
    %c32_283 = arith.constant 32 : index
    %c0_284 = arith.constant 0 : index
    %343 = vector.load %arg6[%c32_283, %c0_284] : memref<64x128xf32, #tpu.memory_space<vmem>>, vector<8x128xf32>
    %344 = arith.truncf %342 : vector<8x32xf32> to vector<8x32xbf16>
    %cst_285 = arith.constant dense<0.000000e+00> : vector<8x128xf32>
    %345 = tpu.matmul %344, %256, %cst_285 {dimension_numbers = #tpu.dot_dimension_numbers<[1], [0], [0], [1], [0, 0, 1, 1], [], []>} : vector<8x32xbf16>, vector<32x128xbf16>, vector<8x128xf32> -> vector<8x128xf32>
    %346 = arith.addf %343, %345 : vector<8x128xf32>
    %cst_286 = arith.constant 5.000000e-01 : f32
    %347 = vector.broadcast %cst_286 : f32 to vector<8x128xf32>
    %348 = arith.mulf %347, %346 : vector<8x128xf32>
    %349 = math.tanh %348 : vector<8x128xf32>
    %cst_287 = arith.constant 5.000000e-01 : f32
    %350 = vector.broadcast %cst_287 : f32 to vector<8x128xf32>
    %351 = arith.mulf %350, %349 : vector<8x128xf32>
    %cst_288 = arith.constant 5.000000e-01 : f32
    %352 = vector.broadcast %cst_288 : f32 to vector<8x128xf32>
    %353 = arith.addf %351, %352 : vector<8x128xf32>
    %354 = math.tanh %346 : vector<8x128xf32>
    %355 = vector.extract_strided_slice %353 {offsets = [0, 0], sizes = [8, 32], strides = [1, 1]} : vector<8x128xf32> to vector<8x32xf32>
    %356 = vector.extract_strided_slice %353 {offsets = [0, 32], sizes = [8, 32], strides = [1, 1]} : vector<8x128xf32> to vector<8x32xf32>
    %357 = vector.extract_strided_slice %354 {offsets = [0, 64], sizes = [8, 32], strides = [1, 1]} : vector<8x128xf32> to vector<8x32xf32>
    %358 = vector.extract_strided_slice %353 {offsets = [0, 96], sizes = [8, 32], strides = [1, 1]} : vector<8x128xf32> to vector<8x32xf32>
    %359 = arith.mulf %356, %340 : vector<8x32xf32>
    %360 = arith.mulf %355, %357 : vector<8x32xf32>
    %361 = arith.addf %359, %360 : vector<8x32xf32>
    %362 = math.tanh %361 : vector<8x32xf32>
    %363 = arith.mulf %358, %362 : vector<8x32xf32>
    %c40_289 = arith.constant 40 : index
    %c0_290 = arith.constant 0 : index
    %364 = vector.load %arg6[%c40_289, %c0_290] : memref<64x128xf32, #tpu.memory_space<vmem>>, vector<8x128xf32>
    %365 = arith.truncf %363 : vector<8x32xf32> to vector<8x32xbf16>
    %cst_291 = arith.constant dense<0.000000e+00> : vector<8x128xf32>
    %366 = tpu.matmul %365, %256, %cst_291 {dimension_numbers = #tpu.dot_dimension_numbers<[1], [0], [0], [1], [0, 0, 1, 1], [], []>} : vector<8x32xbf16>, vector<32x128xbf16>, vector<8x128xf32> -> vector<8x128xf32>
    %367 = arith.addf %364, %366 : vector<8x128xf32>
    %cst_292 = arith.constant 5.000000e-01 : f32
    %368 = vector.broadcast %cst_292 : f32 to vector<8x128xf32>
    %369 = arith.mulf %368, %367 : vector<8x128xf32>
    %370 = math.tanh %369 : vector<8x128xf32>
    %cst_293 = arith.constant 5.000000e-01 : f32
    %371 = vector.broadcast %cst_293 : f32 to vector<8x128xf32>
    %372 = arith.mulf %371, %370 : vector<8x128xf32>
    %cst_294 = arith.constant 5.000000e-01 : f32
    %373 = vector.broadcast %cst_294 : f32 to vector<8x128xf32>
    %374 = arith.addf %372, %373 : vector<8x128xf32>
    %375 = math.tanh %367 : vector<8x128xf32>
    %376 = vector.extract_strided_slice %374 {offsets = [0, 0], sizes = [8, 32], strides = [1, 1]} : vector<8x128xf32> to vector<8x32xf32>
    %377 = vector.extract_strided_slice %374 {offsets = [0, 32], sizes = [8, 32], strides = [1, 1]} : vector<8x128xf32> to vector<8x32xf32>
    %378 = vector.extract_strided_slice %375 {offsets = [0, 64], sizes = [8, 32], strides = [1, 1]} : vector<8x128xf32> to vector<8x32xf32>
    %379 = vector.extract_strided_slice %374 {offsets = [0, 96], sizes = [8, 32], strides = [1, 1]} : vector<8x128xf32> to vector<8x32xf32>
    %380 = arith.mulf %377, %361 : vector<8x32xf32>
    %381 = arith.mulf %376, %378 : vector<8x32xf32>
    %382 = arith.addf %380, %381 : vector<8x32xf32>
    %383 = math.tanh %382 : vector<8x32xf32>
    %384 = arith.mulf %379, %383 : vector<8x32xf32>
    %c48_295 = arith.constant 48 : index
    %c0_296 = arith.constant 0 : index
    %385 = vector.load %arg6[%c48_295, %c0_296] : memref<64x128xf32, #tpu.memory_space<vmem>>, vector<8x128xf32>
    %386 = arith.truncf %384 : vector<8x32xf32> to vector<8x32xbf16>
    %cst_297 = arith.constant dense<0.000000e+00> : vector<8x128xf32>
    %387 = tpu.matmul %386, %256, %cst_297 {dimension_numbers = #tpu.dot_dimension_numbers<[1], [0], [0], [1], [0, 0, 1, 1], [], []>} : vector<8x32xbf16>, vector<32x128xbf16>, vector<8x128xf32> -> vector<8x128xf32>
    %388 = arith.addf %385, %387 : vector<8x128xf32>
    %cst_298 = arith.constant 5.000000e-01 : f32
    %389 = vector.broadcast %cst_298 : f32 to vector<8x128xf32>
    %390 = arith.mulf %389, %388 : vector<8x128xf32>
    %391 = math.tanh %390 : vector<8x128xf32>
    %cst_299 = arith.constant 5.000000e-01 : f32
    %392 = vector.broadcast %cst_299 : f32 to vector<8x128xf32>
    %393 = arith.mulf %392, %391 : vector<8x128xf32>
    %cst_300 = arith.constant 5.000000e-01 : f32
    %394 = vector.broadcast %cst_300 : f32 to vector<8x128xf32>
    %395 = arith.addf %393, %394 : vector<8x128xf32>
    %396 = math.tanh %388 : vector<8x128xf32>
    %397 = vector.extract_strided_slice %395 {offsets = [0, 0], sizes = [8, 32], strides = [1, 1]} : vector<8x128xf32> to vector<8x32xf32>
    %398 = vector.extract_strided_slice %395 {offsets = [0, 32], sizes = [8, 32], strides = [1, 1]} : vector<8x128xf32> to vector<8x32xf32>
    %399 = vector.extract_strided_slice %396 {offsets = [0, 64], sizes = [8, 32], strides = [1, 1]} : vector<8x128xf32> to vector<8x32xf32>
    %400 = vector.extract_strided_slice %395 {offsets = [0, 96], sizes = [8, 32], strides = [1, 1]} : vector<8x128xf32> to vector<8x32xf32>
    %401 = arith.mulf %398, %382 : vector<8x32xf32>
    %402 = arith.mulf %397, %399 : vector<8x32xf32>
    %403 = arith.addf %401, %402 : vector<8x32xf32>
    %404 = math.tanh %403 : vector<8x32xf32>
    %405 = arith.mulf %400, %404 : vector<8x32xf32>
    %c56_301 = arith.constant 56 : index
    %c0_302 = arith.constant 0 : index
    %406 = vector.load %arg6[%c56_301, %c0_302] : memref<64x128xf32, #tpu.memory_space<vmem>>, vector<8x128xf32>
    %407 = arith.truncf %405 : vector<8x32xf32> to vector<8x32xbf16>
    %cst_303 = arith.constant dense<0.000000e+00> : vector<8x128xf32>
    %408 = tpu.matmul %407, %256, %cst_303 {dimension_numbers = #tpu.dot_dimension_numbers<[1], [0], [0], [1], [0, 0, 1, 1], [], []>} : vector<8x32xbf16>, vector<32x128xbf16>, vector<8x128xf32> -> vector<8x128xf32>
    %409 = arith.addf %406, %408 : vector<8x128xf32>
    %cst_304 = arith.constant 5.000000e-01 : f32
    %410 = vector.broadcast %cst_304 : f32 to vector<8x128xf32>
    %411 = arith.mulf %410, %409 : vector<8x128xf32>
    %412 = math.tanh %411 : vector<8x128xf32>
    %cst_305 = arith.constant 5.000000e-01 : f32
    %413 = vector.broadcast %cst_305 : f32 to vector<8x128xf32>
    %414 = arith.mulf %413, %412 : vector<8x128xf32>
    %cst_306 = arith.constant 5.000000e-01 : f32
    %415 = vector.broadcast %cst_306 : f32 to vector<8x128xf32>
    %416 = arith.addf %414, %415 : vector<8x128xf32>
    %417 = math.tanh %409 : vector<8x128xf32>
    %418 = vector.extract_strided_slice %416 {offsets = [0, 0], sizes = [8, 32], strides = [1, 1]} : vector<8x128xf32> to vector<8x32xf32>
    %419 = vector.extract_strided_slice %416 {offsets = [0, 32], sizes = [8, 32], strides = [1, 1]} : vector<8x128xf32> to vector<8x32xf32>
    %420 = vector.extract_strided_slice %417 {offsets = [0, 64], sizes = [8, 32], strides = [1, 1]} : vector<8x128xf32> to vector<8x32xf32>
    %421 = vector.extract_strided_slice %416 {offsets = [0, 96], sizes = [8, 32], strides = [1, 1]} : vector<8x128xf32> to vector<8x32xf32>
    %422 = arith.mulf %419, %403 : vector<8x32xf32>
    %423 = arith.mulf %418, %420 : vector<8x32xf32>
    %424 = arith.addf %422, %423 : vector<8x32xf32>
    %425 = math.tanh %424 : vector<8x32xf32>
    %426 = arith.mulf %421, %425 : vector<8x32xf32>
    %c0_307 = arith.constant 0 : index
    %c0_308 = arith.constant 0 : index
    %427 = vector.load %arg3[%c0_307, %c0_308] : memref<32x4xf32, #tpu.memory_space<vmem>>, vector<32x4xf32>
    %cst_309 = arith.constant dense<0.000000e+00> : vector<8x4xf32>
    %428 = tpu.matmul %426, %427, %cst_309 {dimension_numbers = #tpu.dot_dimension_numbers<[1], [0], [0], [1], [0, 0, 1, 1], [], []>} : vector<8x32xf32>, vector<32x4xf32>, vector<8x4xf32> -> vector<8x4xf32>
    %c0_310 = arith.constant 0 : index
    %c0_311 = arith.constant 0 : index
    %429 = vector.load %arg4[%c0_310, %c0_311] : memref<1x4xf32, #tpu.memory_space<vmem>>, vector<1x4xf32>
    %430 = vector.broadcast %429 : vector<1x4xf32> to vector<8x4xf32>
    %431 = arith.addf %428, %430 : vector<8x4xf32>
    %cst_312 = arith.constant dense<0xFF800000> : vector<8xf32>
    %432 = vector.multi_reduction <maximumf>, %431, %cst_312 [1] : vector<8x4xf32> to vector<8xf32>
    %433 = vector.shape_cast %432 : vector<8xf32> to vector<8x1xf32>
    %434 = vector.broadcast %433 : vector<8x1xf32> to vector<8x4xf32>
    %435 = arith.subf %431, %434 : vector<8x4xf32>
    %436 = math.exp %435 : vector<8x4xf32>
    %cst_313 = arith.constant dense<0.000000e+00> : vector<8xf32>
    %437 = vector.multi_reduction <add>, %436, %cst_313 [1] : vector<8x4xf32> to vector<8xf32>
    %438 = vector.shape_cast %437 : vector<8xf32> to vector<8x1xf32>
    %439 = math.log %438 : vector<8x1xf32>
    %440 = vector.broadcast %439 : vector<8x1xf32> to vector<8x4xf32>
    %441 = arith.subf %435, %440 : vector<8x4xf32>
    %c0_314 = arith.constant 0 : index
    %c0_315 = arith.constant 0 : index
    %442 = vector.load %arg5[%c0_314, %c0_315] : memref<8x4xf32, #tpu.memory_space<vmem>>, vector<8x4xf32>
    tpu.vector_store %arg5[%c0_314, %c0_315], %441 {strides = array<i32>} : memref<8x4xf32, #tpu.memory_space<vmem>>, vector<8x4xf32>,
    return
  }
}

</mosaic_0001>

<bundles_post_ra>
// kernel: param_lstm_forward.1
= control target key start
LH: loop header
LB: loop body
LE: loop exit
PB: predicated region body
PF: predicated region fallthrough
CT: control target
= control target key end

     0   :  { %10 = vsyncpa [#allocation5], 0  ;;  %s1502_s0 = inlined_call_operand.vmem [shape: s32[2,8], index: 0, kind: input, shape index: {}]   ;;  %s1503_s1 = inlined_call_operand.hbm [shape: f32[50,128], index: 1, kind: input, shape index: {}]   ;;  %s1504_s2 = inlined_call_operand.vmem [shape: bf16[32,128], index: 2, kind: input, shape index: {}]   ;;  %s1505_s3 = inlined_call_operand.vmem [shape: f32[32,4], index: 3, kind: input, shape index: {}]   ;;  %s1506_s4 = inlined_call_operand.vmem [shape: f32[1,4], index: 4, kind: input, shape index: {}]   ;;  %s1507_s5 = inlined_call_operand.vmem [shape: f32[8,4], index: 5, kind: output, shape index: {}]  }
   0x1   :  { %s18_s20 = sshll.u32 %s1502_s0, 4  ;;  %s19_s20 = int_to_ptr.vmem [resolvable:$true] %s18_s20 }
   0x2   :  { %11 = vsyncpa [#allocation4], 0  ;;  %s1296_s21 = scalar_lea.vmem %s19_s20, 32  ;;  %p1301_p1 = scmp.lt.s32.totalorder %s19_s20, %s19_s20 }
   0x3   :  { %p1297_p0 = scmp.ne.s32.totalorder %s19_s20, %s1296_s21  ;;  %p1302_p2 = scmp.lt.s32.totalorder %s1296_s21, %s1296_s21 }
   0x5   :  { %p1303_p3 = por %p1302_p2, %p1301_p1 }
   0x7   :  { %p1304_p4 = pnand %p1303_p3, %p1297_p0 }
   0x9   :  { %1307 = shalt.err (!%p1304_p4)
}
   0xa   :  { %s1332_s22 = smov [#allocation3]   ;;  %s1333_s23 = smov [#allocation6]  }
   0xb   :  { %21 = dma.vmem_to_smem %s19_s20, 32, %s1332_s22, [#allocation5]  }
   0xc   :  { %s27_s24 = sshll.u32 %s1333_s23, 4  ;;  %s28_s24 = int_to_ptr.vmem [resolvable:$true] %s27_s24 }
   0xd   :  { %s1316_s25 = scalar_lea.vmem %s28_s24, 896  ;;  %p1321_p6 = scmp.lt.s32.totalorder %s28_s24, %s28_s24 }
   0xe   :  { %p1317_p5 = scmp.ne.s32.totalorder %s28_s24, %s1316_s25  ;;  %p1322_p7 = scmp.lt.s32.totalorder %s1316_s25, %s1316_s25 }
  0x10   :  { %p1323_p8 = por %p1322_p7, %p1321_p6 }
  0x12   :  { %p1324_p9 = pnand %p1323_p8, %p1317_p5 }
  0x14   :  { %1327 = shalt.err (!%p1324_p9)
}
  0x15   :  { %s1334_s0 = smov 128   ;;  %s1335_s26 = smov 8  }
  0x16   :  { %33 = dma.hbm_to_vmem [thread:$0]  %s1503_s1, 896, %s28_s24, [#allocation4], %s1334_s0, %s1334_s0, %s1335_s26  }
  0x17   :  { %1328 = dma.done.wait [#allocation5], 32  }
  0x18   :  { %1329 = vsyncadd [#allocation5], 4294967264 }
  0x19   :  { %1330 = dma.done.wait [#allocation4], 896  }
  0x1a   :  { %1331 = vsyncadd [#allocation4], 4294966400 }
  0x1b   :  { %46 = sfence }
  0x1c   :  { %v1380_v0 = vld [vmem:[%s1504_s2 + $0x8] sm:$0xff]   ;;  %v1336_v1 = vmov 0.0   ;;  %v1388_v2 = vld [vmem:[%s1504_s2] sm:$0xff]   ;;  %vm1337_vm0 = vmmov 0   ;;  %s48_s1 = sld [smem:[#allocation3]]  ;;  %v1338_v3 = vmov 0  }
  0x1d   :  { %1158 = vmatprep.subr.bf16.mxu0 %v1336_v1  ;;  %1166 = vmatprep.subr.bf16.mxu1 %v1336_v1  ;;  %s1055_s8 = sld [smem:[#allocation3 + $0x80]]  ;;  %s1339_s10 = smov 64   ;;  %vm321_vm1 = vcmask 261120   ;;  %vm971_vm2 = vcmask 31744  }
  0x1e   :  { %1159 = vmatpush3.bf16.msra.mxu0 %v1380_v0  ;;  %1162 = vmatprep.mubr.msk.bf16.mxu0 %vm1337_vm0, %v1336_v1  ;;  %s1340_s11 = smov 32   ;;  %s1062_s12 = sld [smem:[#allocation3 + $0x1]] }
  0x1f   :  { %1160 = vmatprep.subr.bf16.mxu0 %v1336_v1  ;;  %1167 = vmatpush3.bf16.msra.mxu1 %v1380_v0  ;;  %s1063_s13 = sld [smem:[#allocation3 + $0x81]] }
  0x20   :  { %1168 = vmatprep.subr.bf16.mxu1 %v1336_v1  ;;  %1170 = vmatprep.mubr.msk.bf16.mxu1 %vm1337_vm0, %v1336_v1  ;;  %s1070_s16 = sld [smem:[#allocation3 + $0x2]] }
  0x21   :  { %s1071_s17 = sld [smem:[#allocation3 + $0x82]] }
  0x22   :  { %1161 = vmatpush3.bf16.msra.mxu0 %v1388_v2  ;;  %s49_s2 = scalar_lea.vmem [#allocation6], %s48_s1  ;;  %s1078_s20 = sld [smem:[#allocation3 + $0x3]] }
  0x23   :  { %1169 = vmatpush3.bf16.msra.mxu1 %v1388_v2  ;;  %1174 = vmatprep.subr.bf16.mxu0 %v1336_v1  ;;  %v50_v4 = vld [vmem:[%s49_s2] sm:$0x1]  ;;  %s53_s9 = scalar_lea.vmem [#allocation6], %s1055_s8  ;;  %s1079_s21 = sld [smem:[#allocation3 + $0x83]] }
  0x24   :  { %1182 = vmatprep.subr.bf16.mxu1 %v1336_v1  ;;  %51 = vst [vmem:[#allocation2] sm:$0x1] %v50_v4  ;;  %v54_v5 = vld [vmem:[%s53_s9] sm:$0x1]  ;;  %s81_s14 = scalar_lea.vmem [#allocation6], %s1062_s12  ;;  %s1086_s24 = sld [smem:[#allocation3 + $0x4]] }
  0x25   :  { %1163 = vmatmul.mubr.bf16.vlgmr.msra.gmra.mxu0 %v1338_v3  ;;  %v58_v6 = vld [vmem:[%s53_s9] sm:$0x1]  ;;  %55 = vst [vmem:[#allocation2 + $0x1] sm:$0x1] %v54_v5  ;;  %s85_s15 = scalar_lea.vmem [#allocation6], %s1063_s13  ;;  %s1087_s25 = sld [smem:[#allocation3 + $0x84]] }
  0x26   :  { %v62_v7 = vld [vmem:[%s53_s9] sm:$0x1]  ;;  %1175 = vmatpush3.bf16.msra.mxu0 %v1380_v0  ;;  %1178 = vmatprep.mubr.msk.bf16.mxu0 %vm1337_vm0, %v1336_v1  ;;  %59 = vst [vmem:[#allocation2 + $0x2] sm:$0x1] %v58_v6  ;;  %s113_s18 = scalar_lea.vmem [#allocation6], %s1070_s16  ;;  %s1094_s27 = sld [smem:[#allocation3 + $0x5]] }
  0x27   :  { %63 = vst [vmem:[#allocation2 + $0x3] sm:$0x1] %v62_v7  ;;  %v66_v8 = vld [vmem:[%s53_s9] sm:$0x1]  ;;  %1176 = vmatprep.subr.bf16.mxu0 %v1336_v1  ;;  %s117_s19 = scalar_lea.vmem [#allocation6], %s1071_s17  ;;  %s1095_s28 = sld [smem:[#allocation3 + $0x85]] }
  0x28   :  { %v70_v9 = vld [vmem:[%s53_s9] sm:$0x1]  ;;  %67 = vst [vmem:[#allocation2 + $0x4] sm:$0x1] %v66_v8  ;;  %s145_s22 = scalar_lea.vmem [#allocation6], %s1078_s20  ;;  %s1102_s6 = sld [smem:[#allocation3 + $0x6]] }
  0x29   :  { %v74_v10 = vld [vmem:[%s53_s9] sm:$0x1]  ;;  %71 = vst [vmem:[#allocation2 + $0x5] sm:$0x1] %v70_v9  ;;  %s149_s23 = scalar_lea.vmem [#allocation6], %s1079_s21  ;;  %s1103_s7 = sld [smem:[#allocation3 + $0x86]] }
  0x2a   :  { %75 = vst [vmem:[#allocation2 + $0x6] sm:$0x1] %v74_v10  ;;  %v78_v11 = vld [vmem:[%s53_s9] sm:$0x1]  ;;  %1177 = vmatpush3.bf16.msra.mxu0 %v1388_v2  ;;  %s177_s0 = scalar_lea.vmem [#allocation6], %s1086_s24  ;;  %s1110_s2 = sld [smem:[#allocation3 + $0x7]] }
  0x2b   :  { %79 = vst [vmem:[#allocation2 + $0x7] sm:$0x1] %v78_v11  ;;  %1190 = vmatprep.subr.bf16.mxu0 %v1336_v1  ;;  %v82_v29 = vld [vmem:[%s81_s14] sm:$0x1]  ;;  %s181_s26 = scalar_lea.vmem [#allocation6], %s1087_s25  ;;  %s1111_s9 = sld [smem:[#allocation3 + $0x87]] }
  0x2c   :  { %83 = vst [vmem:[#allocation2 + $0x8] sm:$0x1] %v82_v29  ;;  %v86_v31 = vld [vmem:[%s85_s15] sm:$0x1]  ;;  %s209_s29 = scalar_lea.vmem [#allocation6], %s1094_s27 }
  0x2d   :  { %v90_v32 = vld [vmem:[%s85_s15] sm:$0x1]  ;;  %87 = vst [vmem:[#allocation2 + $0x9] sm:$0x1] %v86_v31  ;;  %s213_s30 = scalar_lea.vmem [#allocation6], %s1095_s28 }
  0x2e   :  { %v94_v33 = vld [vmem:[%s85_s15] sm:$0x1]  ;;  %91 = vst [vmem:[#allocation2 + $0xa] sm:$0x1] %v90_v32  ;;  %s241_s1 = scalar_lea.vmem [#allocation6], %s1102_s6 }
  0x2f   :  { %95 = vst [vmem:[#allocation2 + $0xb] sm:$0x1] %v94_v33  ;;  %v98_v35 = vld [vmem:[%s85_s15] sm:$0x1]  ;;  %s245_s8 = scalar_lea.vmem [#allocation6], %s1103_s7 }
  0x30   :  { %v102_v36 = vld [vmem:[%s85_s15] sm:$0x1]  ;;  %99 = vst [vmem:[#allocation2 + $0xc] sm:$0x1] %v98_v35  ;;  %s273_s12 = scalar_lea.vmem [#allocation6], %s1110_s2 }
  0x31   :  { %v106_v37 = vld [vmem:[%s85_s15] sm:$0x1]  ;;  %103 = vst [vmem:[#allocation2 + $0xd] sm:$0x1] %v102_v36  ;;  %s277_s13 = scalar_lea.vmem [#allocation6], %s1111_s9 }
  0x32   :  { %v308_v12 = vld [vmem:[#allocation2] sm:$0xff]  ;;  %107 = vst [vmem:[#allocation2 + $0xe] sm:$0x1] %v106_v37 }
  0x33   :  { %v110_v38 = vld [vmem:[%s85_s15] sm:$0x1] }
  0x34   :  { %111 = vst [vmem:[#allocation2 + $0xf] sm:$0x1] %v110_v38  ;;  %v114_v58 = vld [vmem:[%s113_s18] sm:$0x1] }
  0x35   :  { %115 = vst [vmem:[#allocation2 + $0x10] sm:$0x1] %v114_v58  ;;  %v118_v60 = vld [vmem:[%s117_s19] sm:$0x1] }
  0x36   :  { %v122_v61 = vld [vmem:[%s117_s19] sm:$0x1]  ;;  %119 = vst [vmem:[#allocation2 + $0x11] sm:$0x1] %v118_v60 }
  0x37   :  { %v126_v62 = vld [vmem:[%s117_s19] sm:$0x1]  ;;  %123 = vst [vmem:[#allocation2 + $0x12] sm:$0x1] %v122_v61 }
  0x38   :  { %127 = vst [vmem:[#allocation2 + $0x13] sm:$0x1] %v126_v62  ;;  %v130_v3 = vld [vmem:[%s117_s19] sm:$0x1] }
  0x39   :  { %v134_v4 = vld [vmem:[%s117_s19] sm:$0x1]  ;;  %131 = vst [vmem:[#allocation2 + $0x14] sm:$0x1] %v130_v3 }
  0x3a   :  { %v138_v5 = vld [vmem:[%s117_s19] sm:$0x1]  ;;  %135 = vst [vmem:[#allocation2 + $0x15] sm:$0x1] %v134_v4 }
  0x3b   :  { %v388_v41 = vld [vmem:[#allocation2 + $0x8] sm:$0xff]  ;;  %139 = vst [vmem:[#allocation2 + $0x16] sm:$0x1] %v138_v5  ;;  %v142_v6 = vld [vmem:[%s117_s19] sm:$0x1] }
  0x3c   :  { %143 = vst [vmem:[#allocation2 + $0x17] sm:$0x1] %v142_v6  ;;  %v154_v29 = vld [vmem:[%s149_s23] sm:$0x1] }
  0x3d   :  { %155 = vst [vmem:[#allocation2 + $0x1a] sm:$0x1] %v154_v29  ;;  %v162_v32 = vld [vmem:[%s149_s23] sm:$0x1] }
  0x3e   :  { %v166_v33 = vld [vmem:[%s149_s23] sm:$0x1]  ;;  %163 = vst [vmem:[#allocation2 + $0x1c] sm:$0x1] %v162_v32 }
  0x3f   :  { %167 = vst [vmem:[#allocation2 + $0x1d] sm:$0x1] %v166_v33  ;;  %v174_v35 = vld [vmem:[%s149_s23] sm:$0x1] }
  0x40   :  { %175 = vst [vmem:[#allocation2 + $0x1f] sm:$0x1] %v174_v35  ;;  %v186_v58 = vld [vmem:[%s181_s26] sm:$0x1] }
  0x41   :  { %187 = vst [vmem:[#allocation2 + $0x22] sm:$0x1] %v186_v58  ;;  %v194_v61 = vld [vmem:[%s181_s26] sm:$0x1] }
  0x42   :  { %v198_v62 = vld [vmem:[%s181_s26] sm:$0x1]  ;;  %195 = vst [vmem:[#allocation2 + $0x24] sm:$0x1] %v194_v61 }
  0x43   :  { %v459_v9 = vld [vmem:[#allocation2 + $0x10] sm:$0xff]  ;;  %199 = vst [vmem:[#allocation2 + $0x25] sm:$0x1] %v198_v62  ;;  %v206_v3 = vld [vmem:[%s181_s26] sm:$0x1] }
  0x44   :  { %207 = vst [vmem:[#allocation2 + $0x27] sm:$0x1] %v206_v3  ;;  %v226_v29 = vld [vmem:[%s213_s30] sm:$0x1] }
  0x45   :  { %227 = vst [vmem:[#allocation2 + $0x2c] sm:$0x1] %v226_v29  ;;  %v238_v32 = vld [vmem:[%s213_s30] sm:$0x1] }
  0x46   :  { %239 = vst [vmem:[#allocation2 + $0x2f] sm:$0x1] %v238_v32  ;;  %v266_v58 = vld [vmem:[%s245_s8] sm:$0x1] }
  0x47   :  { %267 = vst [vmem:[#allocation2 + $0x36] sm:$0x1] %v266_v58 }
  0xe5   :  { %v359_v13 = vpop.f32.mrf.mxu0 }
  0xe6   :  { %v365_v14 = vadd.f32 %v359_v13, %v308_v12 }
  0xe7   :  { %v1164_v15 = vpop.f32.mrf.mxu0 }
  0xe8   :  { %1244 = vtanh.f32 %v365_v14  ;;  %v366_v19 = vmul.f32 0.5, %v365_v14 }
  0xe9   :  { %v362_v16 = vpop.f32.mrf.mxu0 }
  0xea   :  { %1246 = vtanh.f32 %v366_v19 }
  0xeb   :  { %v1165_v17 = vpop.f32.mrf.mxu0 }
  0xf5   :  { %v1245_v18 = vpop.eup %1244 }
  0xf6   :  { %373 = vrot.lane.b32.xlu0 %v1245_v18, %s1339_s10 }
  0xf7   :  { %v1247_v20 = vpop.eup %1246 }
  0xf8   :  { %v368_v21 = vmul.f32 0.5, %v1247_v20 }
  0xfa   :  { %v369_v22 = vadd.f32 0.5, %v368_v21 }
  0xfc   :  { %v371_v25 = vmul.f32 0.0, %v369_v22 }
 0x168   :  { %v374_v23 = vpop.permute.xlu0 %373 }
 0x169   :  { %v376_v24 = vmul.f32 %v374_v23, %v369_v22 }
 0x16b   :  { %378 = vrot.lane.b32.xlu0 %v376_v24, %s1340_s11 }
 0x1dd   :  { %v379_v26 = vpop.permute.xlu0 %378 }
 0x1de   :  { %v381_v27 = vadd.f32 %v379_v26, %v371_v25  ;;  %v146_v26 = vld [vmem:[%s145_s22] sm:$0x1] }
 0x1df   :  { %147 = vst [vmem:[#allocation2 + $0x18] sm:$0x1] %v146_v26  ;;  %v218_v26 = vld [vmem:[%s213_s30] sm:$0x1] }
 0x1e0   :  { %1248 = vtanh.f32 %v381_v27  ;;  %219 = vst [vmem:[#allocation2 + $0x2a] sm:$0x1] %v218_v26  ;;  %v298_v26 = vld [vmem:[%s277_s13] sm:$0x1] }
 0x1e1   :  { %299 = vst [vmem:[#allocation2 + $0x3e] sm:$0x1] %v298_v26 }
 0x1ed   :  { %v1249_v28 = vpop.eup %1248 }
 0x1ee   :  { %384 = vrot.lane.b32.xlu1 %v1249_v28, %s1339_s10  ;;  %v150_v28 = vld [vmem:[%s149_s23] sm:$0x1] }
 0x1ef   :  { %151 = vst [vmem:[#allocation2 + $0x19] sm:$0x1] %v150_v28 }
 0x260   :  { %v385_v30 = vpop.permute.xlu1 %384 }
 0x261   :  { %v387_v34 = vmul.f32 %v385_v30, %v369_v22  ;;  %v158_v30 = vld [vmem:[%s149_s23] sm:$0x1] }
 0x262   :  { %159 = vst [vmem:[#allocation2 + $0x1b] sm:$0x1] %v158_v30  ;;  %v230_v30 = vld [vmem:[%s213_s30] sm:$0x1] }
 0x263   :  { %v389_v39 = vpack.c.bf16 %v387_v34, %v387_v34  ;;  %v170_v34 = vld [vmem:[%s149_s23] sm:$0x1]  ;;  %231 = vst [vmem:[#allocation2 + $0x2d] sm:$0x1] %v230_v30 }
 0x264   :  { %171 = vst [vmem:[#allocation2 + $0x1e] sm:$0x1] %v170_v34 }
 0x265   :  { %391 = vrot.lane.b32.xlu1 %v389_v39, %s1340_s11 }
 0x26b   :  { %v530_v38 = vld [vmem:[#allocation2 + $0x18] sm:$0xff] }
 0x2d7   :  { %v392_v40 = vpop.permute.xlu1 %391 }
 0x2d8   :  { %1171 = vmatmul.mubr.msk.bf16.vlgmr.msra.gmra.mxu1 %vm321_vm1, %v392_v40 }
 0x2d9   :  { %1183 = vmatpush3.bf16.msra.mxu1 %v1380_v0  ;;  %1186 = vmatprep.mubr.msk.bf16.mxu1 %vm1337_vm0, %v1336_v1 }
 0x2da   :  { %1184 = vmatprep.subr.bf16.mxu1 %v1336_v1 }
 0x2dd   :  { %1185 = vmatpush3.bf16.msra.mxu1 %v1388_v2 }
 0x2de   :  { %1198 = vmatprep.subr.bf16.mxu1 %v1336_v1 }
 0x398   :  { %v430_v42 = vpop.f32.mrf.mxu1 }
 0x399   :  { %v436_v43 = vadd.f32 %v430_v42, %v388_v41 }
 0x39a   :  { %v1172_v44 = vpop.f32.mrf.mxu1 }
 0x39b   :  { %1250 = vtanh.f32 %v436_v43  ;;  %v437_v48 = vmul.f32 0.5, %v436_v43 }
 0x39c   :  { %v433_v45 = vpop.f32.mrf.mxu1 }
 0x39d   :  { %1252 = vtanh.f32 %v437_v48 }
 0x39e   :  { %v1173_v46 = vpop.f32.mrf.mxu1 }
 0x3a8   :  { %v1251_v47 = vpop.eup %1250 }
 0x3a9   :  { %444 = vrot.lane.b32.xlu0 %v1251_v47, %s1339_s10 }
 0x3aa   :  { %v1253_v49 = vpop.eup %1252 }
 0x3ab   :  { %v439_v50 = vmul.f32 0.5, %v1253_v49 }
 0x3ad   :  { %v440_v51 = vadd.f32 0.5, %v439_v50 }
 0x3af   :  { %v442_v54 = vmul.f32 %v440_v51, %v381_v27 }
 0x41b   :  { %v445_v52 = vpop.permute.xlu0 %444 }
 0x41c   :  { %v447_v53 = vmul.f32 %v445_v52, %v440_v51 }
 0x41e   :  { %449 = vrot.lane.b32.xlu1 %v447_v53, %s1340_s11 }
 0x490   :  { %v450_v55 = vpop.permute.xlu1 %449 }
 0x491   :  { %v452_v56 = vadd.f32 %v450_v55, %v442_v54  ;;  %v178_v55 = vld [vmem:[%s177_s0] sm:$0x1] }
 0x492   :  { %179 = vst [vmem:[#allocation2 + $0x20] sm:$0x1] %v178_v55 }
 0x493   :  { %1254 = vtanh.f32 %v452_v56 }
 0x4a0   :  { %v1255_v57 = vpop.eup %1254 }
 0x4a1   :  { %455 = vrot.lane.b32.xlu0 %v1255_v57, %s1339_s10  ;;  %v182_v57 = vld [vmem:[%s181_s26] sm:$0x1] }
 0x4a2   :  { %183 = vst [vmem:[#allocation2 + $0x21] sm:$0x1] %v182_v57  ;;  %v262_v57 = vld [vmem:[%s245_s8] sm:$0x1] }
 0x4a3   :  { %263 = vst [vmem:[#allocation2 + $0x35] sm:$0x1] %v262_v57 }
 0x513   :  { %v456_v59 = vpop.permute.xlu0 %455 }
 0x514   :  { %v458_v63 = vmul.f32 %v456_v59, %v440_v51  ;;  %v190_v59 = vld [vmem:[%s181_s26] sm:$0x1] }
 0x515   :  { %191 = vst [vmem:[#allocation2 + $0x23] sm:$0x1] %v190_v59  ;;  %v270_v59 = vld [vmem:[%s245_s8] sm:$0x1] }
 0x516   :  { %v460_v7 = vpack.c.bf16 %v458_v63, %v458_v63  ;;  %v202_v63 = vld [vmem:[%s181_s26] sm:$0x1]  ;;  %271 = vst [vmem:[#allocation2 + $0x37] sm:$0x1] %v270_v59 }
 0x517   :  { %203 = vst [vmem:[#allocation2 + $0x26] sm:$0x1] %v202_v63 }
 0x518   :  { %462 = vrot.lane.b32.xlu1 %v460_v7, %s1340_s11 }
 0x51e   :  { %v601_v6 = vld [vmem:[#allocation2 + $0x20] sm:$0xff] }
 0x58a   :  { %v463_v8 = vpop.permute.xlu1 %462 }
 0x58b   :  { %1179 = vmatmul.mubr.msk.bf16.vlgmr.msra.gmra.mxu0 %vm321_vm1, %v463_v8 }
 0x58c   :  { %1191 = vmatpush3.bf16.msra.mxu0 %v1380_v0  ;;  %1194 = vmatprep.mubr.msk.bf16.mxu0 %vm1337_vm0, %v1336_v1 }
 0x58d   :  { %1192 = vmatprep.subr.bf16.mxu0 %v1336_v1 }
 0x590   :  { %1193 = vmatpush3.bf16.msra.mxu0 %v1388_v2 }
 0x591   :  { %1206 = vmatprep.subr.bf16.mxu0 %v1336_v1 }
 0x64b   :  { %v501_v10 = vpop.f32.mrf.mxu0 }
 0x64c   :  { %v507_v11 = vadd.f32 %v501_v10, %v459_v9 }
 0x64d   :  { %v1180_v12 = vpop.f32.mrf.mxu0 }
 0x64e   :  { %1256 = vtanh.f32 %v507_v11  ;;  %v508_v16 = vmul.f32 0.5, %v507_v11 }
 0x64f   :  { %v504_v13 = vpop.f32.mrf.mxu0 }
 0x650   :  { %1258 = vtanh.f32 %v508_v16 }
 0x651   :  { %v1181_v14 = vpop.f32.mrf.mxu0 }
 0x65b   :  { %v1257_v15 = vpop.eup %1256 }
 0x65c   :  { %515 = vrot.lane.b32.xlu0 %v1257_v15, %s1339_s10 }
 0x65d   :  { %v1259_v17 = vpop.eup %1258 }
 0x65e   :  { %v510_v18 = vmul.f32 0.5, %v1259_v17 }
 0x660   :  { %v511_v19 = vadd.f32 0.5, %v510_v18 }
 0x662   :  { %v513_v22 = vmul.f32 %v511_v19, %v452_v56 }
 0x6ce   :  { %v516_v20 = vpop.permute.xlu0 %515 }
 0x6cf   :  { %v518_v21 = vmul.f32 %v516_v20, %v511_v19 }
 0x6d1   :  { %520 = vrot.lane.b32.xlu1 %v518_v21, %s1340_s11 }
 0x743   :  { %v521_v23 = vpop.permute.xlu1 %520 }
 0x744   :  { %v523_v24 = vadd.f32 %v521_v23, %v513_v22  ;;  %v210_v23 = vld [vmem:[%s209_s29] sm:$0x1] }
 0x745   :  { %211 = vst [vmem:[#allocation2 + $0x28] sm:$0x1] %v210_v23 }
 0x746   :  { %1260 = vtanh.f32 %v523_v24 }
 0x753   :  { %v1261_v25 = vpop.eup %1260 }
 0x754   :  { %526 = vrot.lane.b32.xlu0 %v1261_v25, %s1339_s10  ;;  %v214_v25 = vld [vmem:[%s213_s30] sm:$0x1] }
 0x755   :  { %215 = vst [vmem:[#allocation2 + $0x29] sm:$0x1] %v214_v25  ;;  %v294_v25 = vld [vmem:[%s277_s13] sm:$0x1] }
 0x756   :  { %295 = vst [vmem:[#allocation2 + $0x3d] sm:$0x1] %v294_v25 }
 0x7c6   :  { %v527_v27 = vpop.permute.xlu0 %526 }
 0x7c7   :  { %v529_v31 = vmul.f32 %v527_v27, %v511_v19  ;;  %v222_v27 = vld [vmem:[%s213_s30] sm:$0x1] }
 0x7c8   :  { %223 = vst [vmem:[#allocation2 + $0x2b] sm:$0x1] %v222_v27  ;;  %v302_v27 = vld [vmem:[%s277_s13] sm:$0x1] }
 0x7c9   :  { %v531_v36 = vpack.c.bf16 %v529_v31, %v529_v31  ;;  %v234_v31 = vld [vmem:[%s213_s30] sm:$0x1]  ;;  %303 = vst [vmem:[#allocation2 + $0x3f] sm:$0x1] %v302_v27 }
 0x7ca   :  { %235 = vst [vmem:[#allocation2 + $0x2e] sm:$0x1] %v234_v31 }
 0x7cb   :  { %533 = vrot.lane.b32.xlu1 %v531_v36, %s1340_s11 }
 0x7d1   :  { %v672_v35 = vld [vmem:[#allocation2 + $0x28] sm:$0xff] }
 0x83d   :  { %v534_v37 = vpop.permute.xlu1 %533 }
 0x83e   :  { %1187 = vmatmul.mubr.msk.bf16.vlgmr.msra.gmra.mxu1 %vm321_vm1, %v534_v37 }
 0x83f   :  { %1199 = vmatpush3.bf16.msra.mxu1 %v1380_v0  ;;  %1202 = vmatprep.mubr.msk.bf16.mxu1 %vm1337_vm0, %v1336_v1 }
 0x840   :  { %1200 = vmatprep.subr.bf16.mxu1 %v1336_v1 }
 0x843   :  { %1201 = vmatpush3.bf16.msra.mxu1 %v1388_v2 }
 0x844   :  { %1214 = vmatprep.subr.bf16.mxu1 %v1336_v1 }
 0x8fe   :  { %v572_v39 = vpop.f32.mrf.mxu1 }
 0x8ff   :  { %v578_v40 = vadd.f32 %v572_v39, %v530_v38 }
 0x900   :  { %v1188_v41 = vpop.f32.mrf.mxu1 }
 0x901   :  { %1262 = vtanh.f32 %v578_v40  ;;  %v579_v45 = vmul.f32 0.5, %v578_v40 }
 0x902   :  { %v575_v42 = vpop.f32.mrf.mxu1 }
 0x903   :  { %1264 = vtanh.f32 %v579_v45 }
 0x904   :  { %v1189_v43 = vpop.f32.mrf.mxu1 }
 0x90e   :  { %v1263_v44 = vpop.eup %1262 }
 0x90f   :  { %586 = vrot.lane.b32.xlu0 %v1263_v44, %s1339_s10 }
 0x910   :  { %v1265_v46 = vpop.eup %1264 }
 0x911   :  { %v581_v47 = vmul.f32 0.5, %v1265_v46 }
 0x913   :  { %v582_v48 = vadd.f32 0.5, %v581_v47 }
 0x915   :  { %v584_v51 = vmul.f32 %v582_v48, %v523_v24 }
 0x981   :  { %v587_v49 = vpop.permute.xlu0 %586 }
 0x982   :  { %v589_v50 = vmul.f32 %v587_v49, %v582_v48 }
 0x984   :  { %591 = vrot.lane.b32.xlu1 %v589_v50, %s1340_s11  ;;  %v242_v50 = vld [vmem:[%s241_s1] sm:$0x1] }
 0x985   :  { %243 = vst [vmem:[#allocation2 + $0x30] sm:$0x1] %v242_v50 }
 0x9f6   :  { %v592_v52 = vpop.permute.xlu1 %591 }
 0x9f7   :  { %v594_v53 = vadd.f32 %v592_v52, %v584_v51  ;;  %v246_v52 = vld [vmem:[%s245_s8] sm:$0x1] }
 0x9f8   :  { %247 = vst [vmem:[#allocation2 + $0x31] sm:$0x1] %v246_v52  ;;  %v1127_v52 = vld [vmem:[%s1506_s4] ss:$0 sm:$0xff] }
 0x9f9   :  { %1266 = vtanh.f32 %v594_v53 }
 0xa06   :  { %v1267_v54 = vpop.eup %1266 }
 0xa07   :  { %597 = vrot.lane.b32.xlu0 %v1267_v54, %s1339_s10  ;;  %v254_v54 = vld [vmem:[%s245_s8] sm:$0x1] }
 0xa08   :  { %255 = vst [vmem:[#allocation2 + $0x33] sm:$0x1] %v254_v54 }
 0xa79   :  { %v598_v56 = vpop.permute.xlu0 %597 }
 0xa7a   :  { %v600_v60 = vmul.f32 %v598_v56, %v582_v48  ;;  %v258_v56 = vld [vmem:[%s245_s8] sm:$0x1] }
 0xa7b   :  { %259 = vst [vmem:[#allocation2 + $0x34] sm:$0x1] %v258_v56 }
 0xa7c   :  { %v602_v4 = vpack.c.bf16 %v600_v60, %v600_v60 }
 0xa7e   :  { %604 = vrot.lane.b32.xlu1 %v602_v4, %s1340_s11 }
 0xaf0   :  { %v605_v5 = vpop.permute.xlu1 %604 }
 0xaf1   :  { %1195 = vmatmul.mubr.msk.bf16.vlgmr.msra.gmra.mxu0 %vm321_vm1, %v605_v5 }
 0xaf2   :  { %1207 = vmatpush3.bf16.msra.mxu0 %v1380_v0  ;;  %1210 = vmatprep.mubr.msk.bf16.mxu0 %vm1337_vm0, %v1336_v1 }
 0xaf3   :  { %1208 = vmatprep.subr.bf16.mxu0 %v1336_v1 }
 0xaf6   :  { %1209 = vmatpush3.bf16.msra.mxu0 %v1388_v2 }
 0xaf7   :  { %1222 = vmatprep.subr.mxu0 %v1336_v1 }
 0xbb1   :  { %v643_v7 = vpop.f32.mrf.mxu0 }
 0xbb2   :  { %v649_v8 = vadd.f32 %v643_v7, %v601_v6 }
 0xbb3   :  { %v1196_v9 = vpop.f32.mrf.mxu0 }
 0xbb4   :  { %1268 = vtanh.f32 %v649_v8  ;;  %v650_v13 = vmul.f32 0.5, %v649_v8 }
 0xbb5   :  { %v646_v10 = vpop.f32.mrf.mxu0 }
 0xbb6   :  { %1270 = vtanh.f32 %v650_v13 }
 0xbb7   :  { %v1197_v11 = vpop.f32.mrf.mxu0 }
 0xbc1   :  { %v1269_v12 = vpop.eup %1268 }
 0xbc2   :  { %657 = vrot.lane.b32.xlu0 %v1269_v12, %s1339_s10 }
 0xbc3   :  { %v1271_v14 = vpop.eup %1270 }
 0xbc4   :  { %v652_v15 = vmul.f32 0.5, %v1271_v14 }
 0xbc6   :  { %v653_v16 = vadd.f32 0.5, %v652_v15 }
 0xbc8   :  { %v655_v19 = vmul.f32 %v653_v16, %v594_v53  ;;  %v250_v53 = vld [vmem:[%s245_s8] sm:$0x1] }
 0xbc9   :  { %251 = vst [vmem:[#allocation2 + $0x32] sm:$0x1] %v250_v53 }
 0xbd0   :  { %v743_v62 = vld [vmem:[#allocation2 + $0x30] sm:$0xff] }
 0xc34   :  { %v658_v17 = vpop.permute.xlu0 %657 }
 0xc35   :  { %v660_v18 = vmul.f32 %v658_v17, %v653_v16 }
 0xc37   :  { %662 = vrot.lane.b32.xlu1 %v660_v18, %s1340_s11  ;;  %v274_v18 = vld [vmem:[%s273_s12] sm:$0x1] }
 0xc38   :  { %275 = vst [vmem:[#allocation2 + $0x38] sm:$0x1] %v274_v18 }
 0xca9   :  { %v663_v20 = vpop.permute.xlu1 %662 }
 0xcaa   :  { %v665_v21 = vadd.f32 %v663_v20, %v655_v19  ;;  %v278_v20 = vld [vmem:[%s277_s13] sm:$0x1] }
 0xcab   :  { %279 = vst [vmem:[#allocation2 + $0x39] sm:$0x1] %v278_v20 }
 0xcac   :  { %1272 = vtanh.f32 %v665_v21 }
 0xcb9   :  { %v1273_v22 = vpop.eup %1272 }
 0xcba   :  { %668 = vrot.lane.b32.xlu0 %v1273_v22, %s1339_s10  ;;  %v286_v22 = vld [vmem:[%s277_s13] sm:$0x1] }
 0xcbb   :  { %287 = vst [vmem:[#allocation2 + $0x3b] sm:$0x1] %v286_v22 }
 0xd2c   :  { %v669_v24 = vpop.permute.xlu0 %668 }
 0xd2d   :  { %v671_v28 = vmul.f32 %v669_v24, %v653_v16  ;;  %v290_v24 = vld [vmem:[%s277_s13] sm:$0x1] }
 0xd2e   :  { %291 = vst [vmem:[#allocation2 + $0x3c] sm:$0x1] %v290_v24 }
 0xd2f   :  { %v673_v33 = vpack.c.bf16 %v671_v28, %v671_v28 }
 0xd31   :  { %675 = vrot.lane.b32.xlu1 %v673_v33, %s1340_s11 }
 0xda3   :  { %v676_v34 = vpop.permute.xlu1 %675 }
 0xda4   :  { %1203 = vmatmul.mubr.msk.bf16.vlgmr.msra.gmra.mxu1 %vm321_vm1, %v676_v34 }
 0xda5   :  { %1215 = vmatpush3.bf16.msra.mxu1 %v1380_v0  ;;  %1218 = vmatprep.mubr.msk.bf16.mxu1 %vm1337_vm0, %v1336_v1 }
 0xda6   :  { %1216 = vmatprep.subr.bf16.mxu1 %v1336_v1 }
 0xda9   :  { %1217 = vmatpush3.bf16.msra.mxu1 %v1388_v2 }
 0xe64   :  { %v714_v36 = vpop.f32.mrf.mxu1 }
 0xe65   :  { %v720_v37 = vadd.f32 %v714_v36, %v672_v35 }
 0xe66   :  { %v1204_v38 = vpop.f32.mrf.mxu1 }
 0xe67   :  { %1274 = vtanh.f32 %v720_v37  ;;  %v721_v42 = vmul.f32 0.5, %v720_v37 }
 0xe68   :  { %v717_v39 = vpop.f32.mrf.mxu1 }
 0xe69   :  { %1276 = vtanh.f32 %v721_v42 }
 0xe6a   :  { %v1205_v40 = vpop.f32.mrf.mxu1 }
 0xe74   :  { %v1275_v41 = vpop.eup %1274 }
 0xe75   :  { %728 = vrot.lane.b32.xlu0 %v1275_v41, %s1339_s10 }
 0xe76   :  { %v1277_v0 = vpop.eup %1276 }
 0xe77   :  { %v723_v43 = vmul.f32 0.5, %v1277_v0 }
 0xe79   :  { %v724_v44 = vadd.f32 0.5, %v723_v43 }
 0xe7b   :  { %v726_v2 = vmul.f32 %v724_v44, %v665_v21  ;;  %v282_v21 = vld [vmem:[%s277_s13] sm:$0x1] }
 0xe7c   :  { %283 = vst [vmem:[#allocation2 + $0x3a] sm:$0x1] %v282_v21 }
 0xe83   :  { %v814_v30 = vld [vmem:[#allocation2 + $0x38] sm:$0xff] }
 0xee7   :  { %v729_v45 = vpop.permute.xlu0 %728 }
 0xee8   :  { %v731_v46 = vmul.f32 %v729_v45, %v724_v44  ;;  %v888_v45 = vld [vmem:[%s1505_s3 + $0x18] sm:$0xff] }
 0xeea   :  { %733 = vrot.lane.b32.xlu1 %v731_v46, %s1340_s11  ;;  %v887_v46 = vld [vmem:[%s1505_s3 + $0x10] sm:$0xff] }
 0xf5c   :  { %v734_v47 = vpop.permute.xlu1 %733 }
 0xf5d   :  { %v736_v48 = vadd.f32 %v734_v47, %v726_v2  ;;  %v886_v2 = vld [vmem:[%s1505_s3 + $0x8] sm:$0xff]  ;;  %v885_v47 = vld [vmem:[%s1505_s3] sm:$0xff] }
 0xf5f   :  { %1278 = vtanh.f32 %v736_v48 }
 0xf6c   :  { %v1279_v49 = vpop.eup %1278 }
 0xf6d   :  { %739 = vrot.lane.b32.xlu0 %v1279_v49, %s1339_s10 }
 0xfdf   :  { %v740_v51 = vpop.permute.xlu0 %739 }
 0xfe0   :  { %v742_v55 = vmul.f32 %v740_v51, %v724_v44 }
 0xfe2   :  { %v744_v60 = vpack.c.bf16 %v742_v55, %v742_v55 }
 0xfe4   :  { %746 = vrot.lane.b32.xlu1 %v744_v60, %s1340_s11 }
0x1056   :  { %v747_v61 = vpop.permute.xlu1 %746 }
0x1057   :  { %1211 = vmatmul.mubr.msk.bf16.vlgmr.msra.gmra.mxu0 %vm321_vm1, %v747_v61 }
0x1058   :  { %1230 = vmatprep.mubr.msk.f32.mxu0 %vm1337_vm0, %v1336_v1  ;;  %1223 = vmatpush3.msra.mxu0 %v888_v45 }
0x1059   :  { %1224 = vmatprep.subr.mxu0 %v1336_v1 }
0x105a   :  { %1225 = vmatpush3.msra.mxu0 %v887_v46 }
0x105b   :  { %1226 = vmatprep.subr.mxu0 %v1336_v1 }
0x105c   :  { %1227 = vmatpush3.msra.mxu0 %v886_v2 }
0x105d   :  { %1228 = vmatprep.subr.mxu0 %v1336_v1 }
0x105e   :  { %1229 = vmatpush3.msra.mxu0 %v885_v47 }
0x1117   :  { %v785_v63 = vpop.f32.mrf.mxu0 }
0x1118   :  { %v791_v3 = vadd.f32 %v785_v63, %v743_v62 }
0x1119   :  { %v1212_v4 = vpop.f32.mrf.mxu0 }
0x111a   :  { %1280 = vtanh.f32 %v791_v3  ;;  %v792_v8 = vmul.f32 0.5, %v791_v3 }
0x111b   :  { %v788_v5 = vpop.f32.mrf.mxu0 }
0x111c   :  { %1282 = vtanh.f32 %v792_v8 }
0x111d   :  { %v1213_v6 = vpop.f32.mrf.mxu0 }
0x1127   :  { %v1281_v7 = vpop.eup %1280 }
0x1128   :  { %799 = vrot.lane.b32.xlu0 %v1281_v7, %s1339_s10 }
0x1129   :  { %v1283_v9 = vpop.eup %1282 }
0x112a   :  { %v794_v10 = vmul.f32 0.5, %v1283_v9 }
0x112c   :  { %v795_v11 = vadd.f32 0.5, %v794_v10 }
0x112e   :  { %v797_v14 = vmul.f32 %v795_v11, %v736_v48 }
0x119a   :  { %v800_v12 = vpop.permute.xlu0 %799 }
0x119b   :  { %v802_v13 = vmul.f32 %v800_v12, %v795_v11 }
0x119d   :  { %804 = vrot.lane.b32.xlu1 %v802_v13, %s1340_s11 }
0x120f   :  { %v805_v15 = vpop.permute.xlu1 %804 }
0x1210   :  { %v807_v16 = vadd.f32 %v805_v15, %v797_v14 }
0x1212   :  { %1284 = vtanh.f32 %v807_v16 }
0x121f   :  { %v1285_v17 = vpop.eup %1284 }
0x1220   :  { %810 = vrot.lane.b32.xlu0 %v1285_v17, %s1339_s10 }
0x1292   :  { %v811_v19 = vpop.permute.xlu0 %810 }
0x1293   :  { %v813_v23 = vmul.f32 %v811_v19, %v795_v11 }
0x1295   :  { %v815_v28 = vpack.c.bf16 %v813_v23, %v813_v23 }
0x1297   :  { %817 = vrot.lane.b32.xlu1 %v815_v28, %s1340_s11 }
0x1309   :  { %v818_v29 = vpop.permute.xlu1 %817 }
0x130a   :  { %1219 = vmatmul.mubr.msk.bf16.vlgmr.msra.gmra.mxu1 %vm321_vm1, %v818_v29 }
0x13ca   :  { %v856_v31 = vpop.f32.mrf.mxu1 }
0x13cb   :  { %v862_v32 = vadd.f32 %v856_v31, %v814_v30 }
0x13cc   :  { %v1220_v33 = vpop.f32.mrf.mxu1 }
0x13cd   :  { %1286 = vtanh.f32 %v862_v32  ;;  %v863_v37 = vmul.f32 0.5, %v862_v32 }
0x13ce   :  { %v859_v34 = vpop.f32.mrf.mxu1 }
0x13cf   :  { %1288 = vtanh.f32 %v863_v37 }
0x13d0   :  { %v1221_v35 = vpop.f32.mrf.mxu1 }
0x13da   :  { %v1287_v36 = vpop.eup %1286 }
0x13db   :  { %870 = vrot.lane.b32.xlu0 %v1287_v36, %s1339_s10 }
0x13dc   :  { %v1289_v38 = vpop.eup %1288 }
0x13dd   :  { %v865_v39 = vmul.f32 0.5, %v1289_v38 }
0x13df   :  { %v866_v40 = vadd.f32 0.5, %v865_v39 }
0x13e1   :  { %v868_v0 = vmul.f32 %v866_v40, %v807_v16 }
0x144d   :  { %v871_v41 = vpop.permute.xlu0 %870 }
0x144e   :  { %v873_v42 = vmul.f32 %v871_v41, %v866_v40 }
0x1450   :  { %875 = vrot.lane.b32.xlu1 %v873_v42, %s1340_s11 }
0x14c2   :  { %v876_v43 = vpop.permute.xlu1 %875 }
0x14c3   :  { %v878_v44 = vadd.f32 %v876_v43, %v868_v0 }
0x14c5   :  { %1290 = vtanh.f32 %v878_v44 }
0x14d2   :  { %v1291_v48 = vpop.eup %1290 }
0x14d3   :  { %881 = vrot.lane.b32.xlu0 %v1291_v48, %s1339_s10 }
0x1545   :  { %v882_v49 = vpop.permute.xlu0 %881 }
0x1546   :  { %v884_v50 = vmul.f32 %v882_v49, %v866_v40 }
0x1548   :  { %897 = vrot.lane.b32.xlu1 %v884_v50, %s1340_s11 }
0x15ba   :  { %v898_v51 = vpop.permute.xlu1 %897 }
0x15bb   :  { %1231 = vmatmul.mubr.msk.f32.vlgmr.msra.gmra.mxu0 %vm321_vm1, %v898_v51 }
0x167b   :  { %v967_v53 = vpop.f32.mrf.mxu0 }
0x167c   :  { %v968_v54 = vadd.f32 %v1127_v52, %v967_v53 }
0x167d   :  { %v1232_v55 = vpop.f32.mrf.mxu0 }
0x167e   :  { %v972_v1 = vsel %vm971_vm2, %v968_v54, -inf }
0x167f   :  { %973 = vmax.xlane.f32.xlu0 %v972_v1 }
0x1708   :  { %v974_v56 = vpop.xlane.xlu0 %973 }
0x1709   :  { %v975_v57 = vsub.f32 %v968_v54, %v974_v56 }
0x170b   :  { %v976_v58 = vmul.f32 1.442695, %v975_v57 }
0x170d   :  { %1292 = vpow2.f32 %v976_v58 }
0x171a   :  { %v1293_v59 = vpop.eup %1292 }
0x171b   :  { %v978_v60 = vsel %vm971_vm2, %v1293_v59, 0.0 }
0x171c   :  { %979 = vadd.xlane.f32.xlu1 %v978_v60 }
0x17a5   :  { %v980_v61 = vpop.xlane.xlu1 %979 }
0x17a6   :  { %1294 = vlog2.f32 %v980_v61 }
0x17b3   :  { %v1295_v62 = vpop.eup %1294 }
0x17b4   :  { %v982_v63 = vmul.f32 0.6931472, %v1295_v62 }
0x17b6   :  { %v983_v3 = vsub.f32 %v975_v57, %v982_v63 }
0x17b8   :  { %984 = vst.msk [vmem:[%s1507_s5] sm:$0xff] %vm971_vm2, %v983_v3 }
0x17b9   :  { %989 = vsyncpa [#allocation4], 1 }
0x17ba   :  { %990 = vsyncpa [#allocation5], 1 }

</bundles_post_ra>
